<compile_context>
chip_gen: v7x
topology: tpu7x:2x2x1
jax: 0.10.0
libtpu: 0.0.40
codegen_flags: <defaults>
</compile_context>

<pallas_src>
import jax
import jax.numpy as jnp
from jax.experimental import pallas as pl
from jax.experimental.pallas import tpu as pltpu


def lstm_kernel(x_ref, w_ih_ref, w_hh_ref, b_ref, w_fc_ref, b_fc_ref, out_ref):
    """Whole-sequence LSTM recurrence + final linear layer, all in VMEM.

    x_ref:    (T*B, I)    time-major flattened input; row t*B + b = x[b, t, :]
    w_ih_ref: (I, 4*Hp)   input->gate weights  (transposed, gate-blocked, padded)
    w_hh_ref: (Hp, 4*Hp)  hidden->gate weights (transposed, gate-blocked, padded)
    b_ref:    (1, 4*Hp)   combined bias (b_ih + b_hh), padded
    w_fc_ref: (Hp, O)     final linear weights (transposed, zero-padded rows)
    b_fc_ref: (1, O)      final linear bias
    out_ref:  (B, O)      output (fc of the last hidden state)
    """
    B = out_ref.shape[0]
    T = x_ref.shape[0] // B
    Hp = w_hh_ref.shape[0]

    # Input projection for ALL timesteps in a single MXU call (bias folded in):
    # (T*B, I) @ (I, 4Hp) + (1, 4Hp) -> (T*B, 4Hp).  Small enough (~8 vregs)
    # to stay resident across the unrolled loop.
    xw = (
        jnp.dot(x_ref[...], w_ih_ref[...], preferred_element_type=jnp.float32)
        + b_ref[...]
    )

    h = jnp.zeros((B, Hp), jnp.float32)
    c = jnp.zeros((B, Hp), jnp.float32)

    # Fully unrolled recurrence: static slices, h/c live in vregs, only the
    # hidden->gate matmul is on the serial critical path.
    # (For large T one would instead stage xw through VMEM scratch or tile T
    #  with an "arbitrary" grid axis; unnecessary at these shapes.)
    for t in range(T):
        gates = xw[t * B:(t + 1) * B, :] + jnp.dot(
            h, w_hh_ref[...], preferred_element_type=jnp.float32
        )  # (B, 4*Hp)
        # 128-lane-aligned gate slices (Hp is a multiple of 128).
        i_g = jax.nn.sigmoid(gates[:, 0 * Hp:1 * Hp])
        f_g = jax.nn.sigmoid(gates[:, 1 * Hp:2 * Hp])
        g_g = jnp.tanh(gates[:, 2 * Hp:3 * Hp])
        o_g = jax.nn.sigmoid(gates[:, 3 * Hp:4 * Hp])
        c = f_g * c + i_g * g_g
        h = o_g * jnp.tanh(c)

    # fc(h_T): padded rows of w_fc are zero, so padded lanes contribute nothing.
    out_ref[...] = (
        jnp.dot(h, w_fc_ref[...], preferred_element_type=jnp.float32)
        + b_fc_ref[...]
    ).astype(out_ref.dtype)


def lstm_model_forward(x_btI, w_ih, w_hh, b_ih, b_hh, w_fc, b_fc):
    """x_btI: (B, T, I) PyTorch batch-first input. Returns (B, O)."""
    B, T, I = x_btI.shape
    H = w_hh.shape[1]
    O = w_fc.shape[0]
    Hp = ((H + 127) // 128) * 128  # lane-align each gate block
    f32 = jnp.float32

    # Gate-blocked, transposed, zero-padded parameters so every in-kernel
    # matmul is a plain `x @ W` and every gate slice is 128-lane aligned.
    w_ih_t = jnp.transpose(w_ih.reshape(4, H, I), (2, 0, 1))          # (I, 4, H)
    w_ih_p = jnp.zeros((I, 4, Hp), f32).at[:, :, :H].set(w_ih_t)
    w_ih_p = w_ih_p.reshape(I, 4 * Hp)                                # (I, 4Hp)

    w_hh_t = jnp.transpose(w_hh.reshape(4, H, H), (2, 0, 1))          # (H, 4, H)
    w_hh_p = jnp.zeros((Hp, 4, Hp), f32).at[:H, :, :H].set(w_hh_t)
    w_hh_p = w_hh_p.reshape(Hp, 4 * Hp)                               # (Hp, 4Hp)

    b = (b_ih + b_hh).reshape(4, H)
    b_p = jnp.zeros((4, Hp), f32).at[:, :H].set(b).reshape(1, 4 * Hp)  # (1, 4Hp)

    w_fc_p = jnp.zeros((Hp, O), f32).at[:H, :].set(jnp.transpose(w_fc))  # (Hp, O)
    b_fc_r = b_fc.reshape(1, O)

    # Time-major, flattened: row t*B + b = x[b, t, :]  (layout plumbing only).
    x_tb = jnp.transpose(x_btI, (1, 0, 2)).reshape(T * B, I)

    vmem = pl.BlockSpec(memory_space=pltpu.MemorySpace.VMEM)
    return pl.pallas_call(
        lstm_kernel,
        out_shape=jax.ShapeDtypeStruct((B, O), jnp.float32),
        in_specs=[vmem] * 6,
        out_specs=vmem,
    )(x_tb, w_ih_p, w_hh_p, b_p, w_fc_p, b_fc_r)


def _reference_forward(x, w_ih, w_hh, b_ih, b_hh, w_fc, b_fc):
    """Pure-JAX reference matching PyTorch nn.LSTM semantics."""
    B, T, I = x.shape
    H = w_hh.shape[1]
    h = jnp.zeros((B, H), jnp.float32)
    c = jnp.zeros((B, H), jnp.float32)
    for t in range(T):
        gates = x[:, t, :] @ w_ih.T + b_ih + h @ w_hh.T + b_hh
        i = jax.nn.sigmoid(gates[:, 0 * H:1 * H])
        f = jax.nn.sigmoid(gates[:, 1 * H:2 * H])
        g = jnp.tanh(gates[:, 2 * H:3 * H])
        o = jax.nn.sigmoid(gates[:, 3 * H:4 * H])
        c = f * c + i * g
        h = o * jnp.tanh(c)
    return h @ w_fc.T + b_fc


if __name__ == "__main__":
    input_size = 8
    hidden_size = 64
    output_size = 1
    batch = 2
    seq = 8

    key = jax.random.PRNGKey(0)
    ks = jax.random.split(key, 7)
    bound = 1.0 / jnp.sqrt(hidden_size)

    # Deterministic synthetic parameters (PyTorch-style uniform init ranges).
    w_ih = jax.random.uniform(ks[0], (4 * hidden_size, input_size),
                              jnp.float32, -bound, bound)
    w_hh = jax.random.uniform(ks[1], (4 * hidden_size, hidden_size),
                              jnp.float32, -bound, bound)
    b_ih = jax.random.uniform(ks[2], (4 * hidden_size,), jnp.float32, -bound, bound)
    b_hh = jax.random.uniform(ks[3], (4 * hidden_size,), jnp.float32, -bound, bound)
    w_fc = jax.random.uniform(ks[4], (output_size, hidden_size),
                              jnp.float32, -bound, bound)
    b_fc = jax.random.uniform(ks[5], (output_size,), jnp.float32, -bound, bound)

    x = jax.random.normal(ks[6], (batch, seq, input_size), jnp.float32)

    out = lstm_model_forward(x, w_ih, w_hh, b_ih, b_hh, w_fc, b_fc)
    out = jax.block_until_ready(out)

    ref = _reference_forward(x, w_ih, w_hh, b_ih, b_hh, w_fc, b_fc)
    assert out.shape == (batch, output_size)
    assert jnp.allclose(out, ref, atol=1e-5, rtol=1e-5), (out, ref)

    print("KERNEL_OK")
</pallas_src>

<mosaic_0001>
module attributes {stable_mosaic.version = 11 : i64} {
  func.func @lstm_kernel(%arg0: memref<16x8xf32, #tpu.memory_space<vmem>>, %arg1: memref<8x512xf32, #tpu.memory_space<vmem>>, %arg2: memref<128x512xf32, #tpu.memory_space<vmem>>, %arg3: memref<1x512xf32, #tpu.memory_space<vmem>>, %arg4: memref<128x1xf32, #tpu.memory_space<vmem>>, %arg5: memref<1x1xf32, #tpu.memory_space<vmem>>, %arg6: memref<2x1xf32, #tpu.memory_space<vmem>>) attributes {dimension_semantics = [], scalar_prefetch = 0 : i64, scratch_operands = 0 : i64, tpu.core_type = #tpu.core_type<tc>} {
    %c0 = arith.constant 0 : index
    %c0_0 = arith.constant 0 : index
    %0 = vector.load %arg0[%c0, %c0_0] : memref<16x8xf32, #tpu.memory_space<vmem>>, vector<16x8xf32>
    %c0_1 = arith.constant 0 : index
    %c0_2 = arith.constant 0 : index
    %1 = vector.load %arg1[%c0_1, %c0_2] : memref<8x512xf32, #tpu.memory_space<vmem>>, vector<8x512xf32>
    %cst = arith.constant dense<0.000000e+00> : vector<16x512xf32>
    %2 = tpu.matmul %0, %1, %cst {dimension_numbers = #tpu.dot_dimension_numbers<[1], [0], [0], [1], [0, 0, 1, 1], [], []>} : vector<16x8xf32>, vector<8x512xf32>, vector<16x512xf32> -> vector<16x512xf32>
    %c0_3 = arith.constant 0 : index
    %c0_4 = arith.constant 0 : index
    %3 = vector.load %arg3[%c0_3, %c0_4] : memref<1x512xf32, #tpu.memory_space<vmem>>, vector<1x512xf32>
    %4 = vector.broadcast %3 : vector<1x512xf32> to vector<16x512xf32>
    %5 = arith.addf %2, %4 : vector<16x512xf32>
    %cst_5 = arith.constant 0.000000e+00 : f32
    %6 = vector.broadcast %cst_5 : f32 to vector<2x128xf32>
    %cst_6 = arith.constant 0.000000e+00 : f32
    %7 = vector.broadcast %cst_6 : f32 to vector<2x128xf32>
    %8 = vector.extract_strided_slice %5 {offsets = [0, 0], sizes = [2, 512], strides = [1, 1]} : vector<16x512xf32> to vector<2x512xf32>
    %c0_7 = arith.constant 0 : index
    %c0_8 = arith.constant 0 : index
    %9 = vector.load %arg2[%c0_7, %c0_8] : memref<128x512xf32, #tpu.memory_space<vmem>>, vector<128x512xf32>
    %cst_9 = arith.constant dense<0.000000e+00> : vector<2x512xf32>
    %10 = tpu.matmul %6, %9, %cst_9 {dimension_numbers = #tpu.dot_dimension_numbers<[1], [0], [0], [1], [0, 0, 1, 1], [], []>} : vector<2x128xf32>, vector<128x512xf32>, vector<2x512xf32> -> vector<2x512xf32>
    %11 = arith.addf %8, %10 : vector<2x512xf32>
    %12 = vector.extract_strided_slice %11 {offsets = [0, 0], sizes = [2, 128], strides = [1, 1]} : vector<2x512xf32> to vector<2x128xf32>
    %13 = arith.negf %12 : vector<2x128xf32>
    %14 = math.exp %13 : vector<2x128xf32>
    %cst_10 = arith.constant 1.000000e+00 : f32
    %15 = vector.broadcast %cst_10 : f32 to vector<2x128xf32>
    %16 = arith.addf %15, %14 : vector<2x128xf32>
    %17 = arith.divf %15, %16 : vector<2x128xf32>
    %18 = vector.extract_strided_slice %11 {offsets = [0, 128], sizes = [2, 128], strides = [1, 1]} : vector<2x512xf32> to vector<2x128xf32>
    %19 = arith.negf %18 : vector<2x128xf32>
    %20 = math.exp %19 : vector<2x128xf32>
    %cst_11 = arith.constant 1.000000e+00 : f32
    %21 = vector.broadcast %cst_11 : f32 to vector<2x128xf32>
    %22 = arith.addf %21, %20 : vector<2x128xf32>
    %23 = arith.divf %21, %22 : vector<2x128xf32>
    %24 = vector.extract_strided_slice %11 {offsets = [0, 256], sizes = [2, 128], strides = [1, 1]} : vector<2x512xf32> to vector<2x128xf32>
    %25 = math.tanh %24 : vector<2x128xf32>
    %26 = vector.extract_strided_slice %11 {offsets = [0, 384], sizes = [2, 128], strides = [1, 1]} : vector<2x512xf32> to vector<2x128xf32>
    %27 = arith.negf %26 : vector<2x128xf32>
    %28 = math.exp %27 : vector<2x128xf32>
    %cst_12 = arith.constant 1.000000e+00 : f32
    %29 = vector.broadcast %cst_12 : f32 to vector<2x128xf32>
    %30 = arith.addf %29, %28 : vector<2x128xf32>
    %31 = arith.divf %29, %30 : vector<2x128xf32>
    %32 = arith.mulf %23, %7 : vector<2x128xf32>
    %33 = arith.mulf %17, %25 : vector<2x128xf32>
    %34 = arith.addf %32, %33 : vector<2x128xf32>
    %35 = math.tanh %34 : vector<2x128xf32>
    %36 = arith.mulf %31, %35 : vector<2x128xf32>
    %37 = vector.extract_strided_slice %5 {offsets = [2, 0], sizes = [2, 512], strides = [1, 1]} : vector<16x512xf32> to vector<2x512xf32>
    %c0_13 = arith.constant 0 : index
    %c0_14 = arith.constant 0 : index
    %38 = vector.load %arg2[%c0_13, %c0_14] : memref<128x512xf32, #tpu.memory_space<vmem>>, vector<128x512xf32>
    %cst_15 = arith.constant dense<0.000000e+00> : vector<2x512xf32>
    %39 = tpu.matmul %36, %38, %cst_15 {dimension_numbers = #tpu.dot_dimension_numbers<[1], [0], [0], [1], [0, 0, 1, 1], [], []>} : vector<2x128xf32>, vector<128x512xf32>, vector<2x512xf32> -> vector<2x512xf32>
    %40 = arith.addf %37, %39 : vector<2x512xf32>
    %41 = vector.extract_strided_slice %40 {offsets = [0, 0], sizes = [2, 128], strides = [1, 1]} : vector<2x512xf32> to vector<2x128xf32>
    %42 = arith.negf %41 : vector<2x128xf32>
    %43 = math.exp %42 : vector<2x128xf32>
    %cst_16 = arith.constant 1.000000e+00 : f32
    %44 = vector.broadcast %cst_16 : f32 to vector<2x128xf32>
    %45 = arith.addf %44, %43 : vector<2x128xf32>
    %46 = arith.divf %44, %45 : vector<2x128xf32>
    %47 = vector.extract_strided_slice %40 {offsets = [0, 128], sizes = [2, 128], strides = [1, 1]} : vector<2x512xf32> to vector<2x128xf32>
    %48 = arith.negf %47 : vector<2x128xf32>
    %49 = math.exp %48 : vector<2x128xf32>
    %cst_17 = arith.constant 1.000000e+00 : f32
    %50 = vector.broadcast %cst_17 : f32 to vector<2x128xf32>
    %51 = arith.addf %50, %49 : vector<2x128xf32>
    %52 = arith.divf %50, %51 : vector<2x128xf32>
    %53 = vector.extract_strided_slice %40 {offsets = [0, 256], sizes = [2, 128], strides = [1, 1]} : vector<2x512xf32> to vector<2x128xf32>
    %54 = math.tanh %53 : vector<2x128xf32>
    %55 = vector.extract_strided_slice %40 {offsets = [0, 384], sizes = [2, 128], strides = [1, 1]} : vector<2x512xf32> to vector<2x128xf32>
    %56 = arith.negf %55 : vector<2x128xf32>
    %57 = math.exp %56 : vector<2x128xf32>
    %cst_18 = arith.constant 1.000000e+00 : f32
    %58 = vector.broadcast %cst_18 : f32 to vector<2x128xf32>
    %59 = arith.addf %58, %57 : vector<2x128xf32>
    %60 = arith.divf %58, %59 : vector<2x128xf32>
    %61 = arith.mulf %52, %34 : vector<2x128xf32>
    %62 = arith.mulf %46, %54 : vector<2x128xf32>
    %63 = arith.addf %61, %62 : vector<2x128xf32>
    %64 = math.tanh %63 : vector<2x128xf32>
    %65 = arith.mulf %60, %64 : vector<2x128xf32>
    %66 = vector.extract_strided_slice %5 {offsets = [4, 0], sizes = [2, 512], strides = [1, 1]} : vector<16x512xf32> to vector<2x512xf32>
    %c0_19 = arith.constant 0 : index
    %c0_20 = arith.constant 0 : index
    %67 = vector.load %arg2[%c0_19, %c0_20] : memref<128x512xf32, #tpu.memory_space<vmem>>, vector<128x512xf32>
    %cst_21 = arith.constant dense<0.000000e+00> : vector<2x512xf32>
    %68 = tpu.matmul %65, %67, %cst_21 {dimension_numbers = #tpu.dot_dimension_numbers<[1], [0], [0], [1], [0, 0, 1, 1], [], []>} : vector<2x128xf32>, vector<128x512xf32>, vector<2x512xf32> -> vector<2x512xf32>
    %69 = arith.addf %66, %68 : vector<2x512xf32>
    %70 = vector.extract_strided_slice %69 {offsets = [0, 0], sizes = [2, 128], strides = [1, 1]} : vector<2x512xf32> to vector<2x128xf32>
    %71 = arith.negf %70 : vector<2x128xf32>
    %72 = math.exp %71 : vector<2x128xf32>
    %cst_22 = arith.constant 1.000000e+00 : f32
    %73 = vector.broadcast %cst_22 : f32 to vector<2x128xf32>
    %74 = arith.addf %73, %72 : vector<2x128xf32>
    %75 = arith.divf %73, %74 : vector<2x128xf32>
    %76 = vector.extract_strided_slice %69 {offsets = [0, 128], sizes = [2, 128], strides = [1, 1]} : vector<2x512xf32> to vector<2x128xf32>
    %77 = arith.negf %76 : vector<2x128xf32>
    %78 = math.exp %77 : vector<2x128xf32>
    %cst_23 = arith.constant 1.000000e+00 : f32
    %79 = vector.broadcast %cst_23 : f32 to vector<2x128xf32>
    %80 = arith.addf %79, %78 : vector<2x128xf32>
    %81 = arith.divf %79, %80 : vector<2x128xf32>
    %82 = vector.extract_strided_slice %69 {offsets = [0, 256], sizes = [2, 128], strides = [1, 1]} : vector<2x512xf32> to vector<2x128xf32>
    %83 = math.tanh %82 : vector<2x128xf32>
    %84 = vector.extract_strided_slice %69 {offsets = [0, 384], sizes = [2, 128], strides = [1, 1]} : vector<2x512xf32> to vector<2x128xf32>
    %85 = arith.negf %84 : vector<2x128xf32>
    %86 = math.exp %85 : vector<2x128xf32>
    %cst_24 = arith.constant 1.000000e+00 : f32
    %87 = vector.broadcast %cst_24 : f32 to vector<2x128xf32>
    %88 = arith.addf %87, %86 : vector<2x128xf32>
    %89 = arith.divf %87, %88 : vector<2x128xf32>
    %90 = arith.mulf %81, %63 : vector<2x128xf32>
    %91 = arith.mulf %75, %83 : vector<2x128xf32>
    %92 = arith.addf %90, %91 : vector<2x128xf32>
    %93 = math.tanh %92 : vector<2x128xf32>
    %94 = arith.mulf %89, %93 : vector<2x128xf32>
    %95 = vector.extract_strided_slice %5 {offsets = [6, 0], sizes = [2, 512], strides = [1, 1]} : vector<16x512xf32> to vector<2x512xf32>
    %c0_25 = arith.constant 0 : index
    %c0_26 = arith.constant 0 : index
    %96 = vector.load %arg2[%c0_25, %c0_26] : memref<128x512xf32, #tpu.memory_space<vmem>>, vector<128x512xf32>
    %cst_27 = arith.constant dense<0.000000e+00> : vector<2x512xf32>
    %97 = tpu.matmul %94, %96, %cst_27 {dimension_numbers = #tpu.dot_dimension_numbers<[1], [0], [0], [1], [0, 0, 1, 1], [], []>} : vector<2x128xf32>, vector<128x512xf32>, vector<2x512xf32> -> vector<2x512xf32>
    %98 = arith.addf %95, %97 : vector<2x512xf32>
    %99 = vector.extract_strided_slice %98 {offsets = [0, 0], sizes = [2, 128], strides = [1, 1]} : vector<2x512xf32> to vector<2x128xf32>
    %100 = arith.negf %99 : vector<2x128xf32>
    %101 = math.exp %100 : vector<2x128xf32>
    %cst_28 = arith.constant 1.000000e+00 : f32
    %102 = vector.broadcast %cst_28 : f32 to vector<2x128xf32>
    %103 = arith.addf %102, %101 : vector<2x128xf32>
    %104 = arith.divf %102, %103 : vector<2x128xf32>
    %105 = vector.extract_strided_slice %98 {offsets = [0, 128], sizes = [2, 128], strides = [1, 1]} : vector<2x512xf32> to vector<2x128xf32>
    %106 = arith.negf %105 : vector<2x128xf32>
    %107 = math.exp %106 : vector<2x128xf32>
    %cst_29 = arith.constant 1.000000e+00 : f32
    %108 = vector.broadcast %cst_29 : f32 to vector<2x128xf32>
    %109 = arith.addf %108, %107 : vector<2x128xf32>
    %110 = arith.divf %108, %109 : vector<2x128xf32>
    %111 = vector.extract_strided_slice %98 {offsets = [0, 256], sizes = [2, 128], strides = [1, 1]} : vector<2x512xf32> to vector<2x128xf32>
    %112 = math.tanh %111 : vector<2x128xf32>
    %113 = vector.extract_strided_slice %98 {offsets = [0, 384], sizes = [2, 128], strides = [1, 1]} : vector<2x512xf32> to vector<2x128xf32>
    %114 = arith.negf %113 : vector<2x128xf32>
    %115 = math.exp %114 : vector<2x128xf32>
    %cst_30 = arith.constant 1.000000e+00 : f32
    %116 = vector.broadcast %cst_30 : f32 to vector<2x128xf32>
    %117 = arith.addf %116, %115 : vector<2x128xf32>
    %118 = arith.divf %116, %117 : vector<2x128xf32>
    %119 = arith.mulf %110, %92 : vector<2x128xf32>
    %120 = arith.mulf %104, %112 : vector<2x128xf32>
    %121 = arith.addf %119, %120 : vector<2x128xf32>
    %122 = math.tanh %121 : vector<2x128xf32>
    %123 = arith.mulf %118, %122 : vector<2x128xf32>
    %124 = vector.extract_strided_slice %5 {offsets = [8, 0], sizes = [2, 512], strides = [1, 1]} : vector<16x512xf32> to vector<2x512xf32>
    %c0_31 = arith.constant 0 : index
    %c0_32 = arith.constant 0 : index
    %125 = vector.load %arg2[%c0_31, %c0_32] : memref<128x512xf32, #tpu.memory_space<vmem>>, vector<128x512xf32>
    %cst_33 = arith.constant dense<0.000000e+00> : vector<2x512xf32>
    %126 = tpu.matmul %123, %125, %cst_33 {dimension_numbers = #tpu.dot_dimension_numbers<[1], [0], [0], [1], [0, 0, 1, 1], [], []>} : vector<2x128xf32>, vector<128x512xf32>, vector<2x512xf32> -> vector<2x512xf32>
    %127 = arith.addf %124, %126 : vector<2x512xf32>
    %128 = vector.extract_strided_slice %127 {offsets = [0, 0], sizes = [2, 128], strides = [1, 1]} : vector<2x512xf32> to vector<2x128xf32>
    %129 = arith.negf %128 : vector<2x128xf32>
    %130 = math.exp %129 : vector<2x128xf32>
    %cst_34 = arith.constant 1.000000e+00 : f32
    %131 = vector.broadcast %cst_34 : f32 to vector<2x128xf32>
    %132 = arith.addf %131, %130 : vector<2x128xf32>
    %133 = arith.divf %131, %132 : vector<2x128xf32>
    %134 = vector.extract_strided_slice %127 {offsets = [0, 128], sizes = [2, 128], strides = [1, 1]} : vector<2x512xf32> to vector<2x128xf32>
    %135 = arith.negf %134 : vector<2x128xf32>
    %136 = math.exp %135 : vector<2x128xf32>
    %cst_35 = arith.constant 1.000000e+00 : f32
    %137 = vector.broadcast %cst_35 : f32 to vector<2x128xf32>
    %138 = arith.addf %137, %136 : vector<2x128xf32>
    %139 = arith.divf %137, %138 : vector<2x128xf32>
    %140 = vector.extract_strided_slice %127 {offsets = [0, 256], sizes = [2, 128], strides = [1, 1]} : vector<2x512xf32> to vector<2x128xf32>
    %141 = math.tanh %140 : vector<2x128xf32>
    %142 = vector.extract_strided_slice %127 {offsets = [0, 384], sizes = [2, 128], strides = [1, 1]} : vector<2x512xf32> to vector<2x128xf32>
    %143 = arith.negf %142 : vector<2x128xf32>
    %144 = math.exp %143 : vector<2x128xf32>
    %cst_36 = arith.constant 1.000000e+00 : f32
    %145 = vector.broadcast %cst_36 : f32 to vector<2x128xf32>
    %146 = arith.addf %145, %144 : vector<2x128xf32>
    %147 = arith.divf %145, %146 : vector<2x128xf32>
    %148 = arith.mulf %139, %121 : vector<2x128xf32>
    %149 = arith.mulf %133, %141 : vector<2x128xf32>
    %150 = arith.addf %148, %149 : vector<2x128xf32>
    %151 = math.tanh %150 : vector<2x128xf32>
    %152 = arith.mulf %147, %151 : vector<2x128xf32>
    %153 = vector.extract_strided_slice %5 {offsets = [10, 0], sizes = [2, 512], strides = [1, 1]} : vector<16x512xf32> to vector<2x512xf32>
    %c0_37 = arith.constant 0 : index
    %c0_38 = arith.constant 0 : index
    %154 = vector.load %arg2[%c0_37, %c0_38] : memref<128x512xf32, #tpu.memory_space<vmem>>, vector<128x512xf32>
    %cst_39 = arith.constant dense<0.000000e+00> : vector<2x512xf32>
    %155 = tpu.matmul %152, %154, %cst_39 {dimension_numbers = #tpu.dot_dimension_numbers<[1], [0], [0], [1], [0, 0, 1, 1], [], []>} : vector<2x128xf32>, vector<128x512xf32>, vector<2x512xf32> -> vector<2x512xf32>
    %156 = arith.addf %153, %155 : vector<2x512xf32>
    %157 = vector.extract_strided_slice %156 {offsets = [0, 0], sizes = [2, 128], strides = [1, 1]} : vector<2x512xf32> to vector<2x128xf32>
    %158 = arith.negf %157 : vector<2x128xf32>
    %159 = math.exp %158 : vector<2x128xf32>
    %cst_40 = arith.constant 1.000000e+00 : f32
    %160 = vector.broadcast %cst_40 : f32 to vector<2x128xf32>
    %161 = arith.addf %160, %159 : vector<2x128xf32>
    %162 = arith.divf %160, %161 : vector<2x128xf32>
    %163 = vector.extract_strided_slice %156 {offsets = [0, 128], sizes = [2, 128], strides = [1, 1]} : vector<2x512xf32> to vector<2x128xf32>
    %164 = arith.negf %163 : vector<2x128xf32>
    %165 = math.exp %164 : vector<2x128xf32>
    %cst_41 = arith.constant 1.000000e+00 : f32
    %166 = vector.broadcast %cst_41 : f32 to vector<2x128xf32>
    %167 = arith.addf %166, %165 : vector<2x128xf32>
    %168 = arith.divf %166, %167 : vector<2x128xf32>
    %169 = vector.extract_strided_slice %156 {offsets = [0, 256], sizes = [2, 128], strides = [1, 1]} : vector<2x512xf32> to vector<2x128xf32>
    %170 = math.tanh %169 : vector<2x128xf32>
    %171 = vector.extract_strided_slice %156 {offsets = [0, 384], sizes = [2, 128], strides = [1, 1]} : vector<2x512xf32> to vector<2x128xf32>
    %172 = arith.negf %171 : vector<2x128xf32>
    %173 = math.exp %172 : vector<2x128xf32>
    %cst_42 = arith.constant 1.000000e+00 : f32
    %174 = vector.broadcast %cst_42 : f32 to vector<2x128xf32>
    %175 = arith.addf %174, %173 : vector<2x128xf32>
    %176 = arith.divf %174, %175 : vector<2x128xf32>
    %177 = arith.mulf %168, %150 : vector<2x128xf32>
    %178 = arith.mulf %162, %170 : vector<2x128xf32>
    %179 = arith.addf %177, %178 : vector<2x128xf32>
    %180 = math.tanh %179 : vector<2x128xf32>
    %181 = arith.mulf %176, %180 : vector<2x128xf32>
    %182 = vector.extract_strided_slice %5 {offsets = [12, 0], sizes = [2, 512], strides = [1, 1]} : vector<16x512xf32> to vector<2x512xf32>
    %c0_43 = arith.constant 0 : index
    %c0_44 = arith.constant 0 : index
    %183 = vector.load %arg2[%c0_43, %c0_44] : memref<128x512xf32, #tpu.memory_space<vmem>>, vector<128x512xf32>
    %cst_45 = arith.constant dense<0.000000e+00> : vector<2x512xf32>
    %184 = tpu.matmul %181, %183, %cst_45 {dimension_numbers = #tpu.dot_dimension_numbers<[1], [0], [0], [1], [0, 0, 1, 1], [], []>} : vector<2x128xf32>, vector<128x512xf32>, vector<2x512xf32> -> vector<2x512xf32>
    %185 = arith.addf %182, %184 : vector<2x512xf32>
    %186 = vector.extract_strided_slice %185 {offsets = [0, 0], sizes = [2, 128], strides = [1, 1]} : vector<2x512xf32> to vector<2x128xf32>
    %187 = arith.negf %186 : vector<2x128xf32>
    %188 = math.exp %187 : vector<2x128xf32>
    %cst_46 = arith.constant 1.000000e+00 : f32
    %189 = vector.broadcast %cst_46 : f32 to vector<2x128xf32>
    %190 = arith.addf %189, %188 : vector<2x128xf32>
    %191 = arith.divf %189, %190 : vector<2x128xf32>
    %192 = vector.extract_strided_slice %185 {offsets = [0, 128], sizes = [2, 128], strides = [1, 1]} : vector<2x512xf32> to vector<2x128xf32>
    %193 = arith.negf %192 : vector<2x128xf32>
    %194 = math.exp %193 : vector<2x128xf32>
    %cst_47 = arith.constant 1.000000e+00 : f32
    %195 = vector.broadcast %cst_47 : f32 to vector<2x128xf32>
    %196 = arith.addf %195, %194 : vector<2x128xf32>
    %197 = arith.divf %195, %196 : vector<2x128xf32>
    %198 = vector.extract_strided_slice %185 {offsets = [0, 256], sizes = [2, 128], strides = [1, 1]} : vector<2x512xf32> to vector<2x128xf32>
    %199 = math.tanh %198 : vector<2x128xf32>
    %200 = vector.extract_strided_slice %185 {offsets = [0, 384], sizes = [2, 128], strides = [1, 1]} : vector<2x512xf32> to vector<2x128xf32>
    %201 = arith.negf %200 : vector<2x128xf32>
    %202 = math.exp %201 : vector<2x128xf32>
    %cst_48 = arith.constant 1.000000e+00 : f32
    %203 = vector.broadcast %cst_48 : f32 to vector<2x128xf32>
    %204 = arith.addf %203, %202 : vector<2x128xf32>
    %205 = arith.divf %203, %204 : vector<2x128xf32>
    %206 = arith.mulf %197, %179 : vector<2x128xf32>
    %207 = arith.mulf %191, %199 : vector<2x128xf32>
    %208 = arith.addf %206, %207 : vector<2x128xf32>
    %209 = math.tanh %208 : vector<2x128xf32>
    %210 = arith.mulf %205, %209 : vector<2x128xf32>
    %211 = vector.extract_strided_slice %5 {offsets = [14, 0], sizes = [2, 512], strides = [1, 1]} : vector<16x512xf32> to vector<2x512xf32>
    %c0_49 = arith.constant 0 : index
    %c0_50 = arith.constant 0 : index
    %212 = vector.load %arg2[%c0_49, %c0_50] : memref<128x512xf32, #tpu.memory_space<vmem>>, vector<128x512xf32>
    %cst_51 = arith.constant dense<0.000000e+00> : vector<2x512xf32>
    %213 = tpu.matmul %210, %212, %cst_51 {dimension_numbers = #tpu.dot_dimension_numbers<[1], [0], [0], [1], [0, 0, 1, 1], [], []>} : vector<2x128xf32>, vector<128x512xf32>, vector<2x512xf32> -> vector<2x512xf32>
    %214 = arith.addf %211, %213 : vector<2x512xf32>
    %215 = vector.extract_strided_slice %214 {offsets = [0, 0], sizes = [2, 128], strides = [1, 1]} : vector<2x512xf32> to vector<2x128xf32>
    %216 = arith.negf %215 : vector<2x128xf32>
    %217 = math.exp %216 : vector<2x128xf32>
    %cst_52 = arith.constant 1.000000e+00 : f32
    %218 = vector.broadcast %cst_52 : f32 to vector<2x128xf32>
    %219 = arith.addf %218, %217 : vector<2x128xf32>
    %220 = arith.divf %218, %219 : vector<2x128xf32>
    %221 = vector.extract_strided_slice %214 {offsets = [0, 128], sizes = [2, 128], strides = [1, 1]} : vector<2x512xf32> to vector<2x128xf32>
    %222 = arith.negf %221 : vector<2x128xf32>
    %223 = math.exp %222 : vector<2x128xf32>
    %cst_53 = arith.constant 1.000000e+00 : f32
    %224 = vector.broadcast %cst_53 : f32 to vector<2x128xf32>
    %225 = arith.addf %224, %223 : vector<2x128xf32>
    %226 = arith.divf %224, %225 : vector<2x128xf32>
    %227 = vector.extract_strided_slice %214 {offsets = [0, 256], sizes = [2, 128], strides = [1, 1]} : vector<2x512xf32> to vector<2x128xf32>
    %228 = math.tanh %227 : vector<2x128xf32>
    %229 = vector.extract_strided_slice %214 {offsets = [0, 384], sizes = [2, 128], strides = [1, 1]} : vector<2x512xf32> to vector<2x128xf32>
    %230 = arith.negf %229 : vector<2x128xf32>
    %231 = math.exp %230 : vector<2x128xf32>
    %cst_54 = arith.constant 1.000000e+00 : f32
    %232 = vector.broadcast %cst_54 : f32 to vector<2x128xf32>
    %233 = arith.addf %232, %231 : vector<2x128xf32>
    %234 = arith.divf %232, %233 : vector<2x128xf32>
    %235 = arith.mulf %226, %208 : vector<2x128xf32>
    %236 = arith.mulf %220, %228 : vector<2x128xf32>
    %237 = arith.addf %235, %236 : vector<2x128xf32>
    %238 = math.tanh %237 : vector<2x128xf32>
    %239 = arith.mulf %234, %238 : vector<2x128xf32>
    %c0_55 = arith.constant 0 : index
    %c0_56 = arith.constant 0 : index
    %240 = vector.load %arg4[%c0_55, %c0_56] : memref<128x1xf32, #tpu.memory_space<vmem>>, vector<128x1xf32>
    %cst_57 = arith.constant dense<0.000000e+00> : vector<2x1xf32>
    %241 = tpu.matmul %239, %240, %cst_57 {dimension_numbers = #tpu.dot_dimension_numbers<[1], [0], [0], [1], [0, 0, 1, 1], [], []>} : vector<2x128xf32>, vector<128x1xf32>, vector<2x1xf32> -> vector<2x1xf32>
    %c0_58 = arith.constant 0 : index
    %c0_59 = arith.constant 0 : index
    %242 = vector.load %arg5[%c0_58, %c0_59] : memref<1x1xf32, #tpu.memory_space<vmem>>, vector<1x1xf32>
    %243 = vector.broadcast %242 : vector<1x1xf32> to vector<2x1xf32>
    %244 = arith.addf %241, %243 : vector<2x1xf32>
    %c0_60 = arith.constant 0 : index
    %c0_61 = arith.constant 0 : index
    %245 = vector.load %arg6[%c0_60, %c0_61] : memref<2x1xf32, #tpu.memory_space<vmem>>, vector<2x1xf32>
    tpu.vector_store %arg6[%c0_60, %c0_61], %244 {strides = array<i32>} : memref<2x1xf32, #tpu.memory_space<vmem>>, vector<2x1xf32>,
    return
  }
}

</mosaic_0001>

<bundles_post_ra>
// kernel: tpu_custom_call.1
= control target key start
LH: loop header
LB: loop body
LE: loop exit
PB: predicated region body
PF: predicated region fallthrough
CT: control target
= control target key end

     0   :  { %s3193_s0 = inlined_call_operand.vmem [shape: f32[16,8], index: 0, kind: input, shape index: {}]   ;;  %s3194_s1 = inlined_call_operand.vmem [shape: f32[8,512], index: 1, kind: input, shape index: {}]   ;;  %s3195_s2 = inlined_call_operand.hbm [shape: f32[128,512], index: 2, kind: input, shape index: {}]   ;;  %s3196_s3 = inlined_call_operand.vmem [shape: f32[1,512], index: 3, kind: input, shape index: {}]   ;;  %s3197_s4 = inlined_call_operand.vmem [shape: f32[128,1], index: 4, kind: input, shape index: {}]   ;;  %s3198_s5 = inlined_call_operand.<no memory space> [shape: f32[1,1], index: 5, kind: input, shape index: {}]   ;;  %s3199_s6 = inlined_call_operand.vmem [shape: f32[2,1], index: 6, kind: output, shape index: {}]  }
   0x1   :  { %v11_v0 = vstv %s3198_s5 }
   0x2   :  { %12 = vst [vmem:[#allocation2] sm:$0x1] %v11_v0 }
   0x3   :  { %13 = vsyncpa [#allocation4], 0  ;;  %s2638_s23 = smov [#allocation3]   ;;  %s2614_s27 = scalar_lea.hbm %s3195_s2, 8192 }
   0x4   :  { %s23_s24 = sshll.u32 %s2638_s23, 4  ;;  %p2615_p0 = scmp.ne.s32.totalorder %s3195_s2, %s2614_s27  ;;  %s24_s24 = int_to_ptr.vmem [resolvable:$true] %s23_s24 }
   0x5   :  { %p2618_p1 = scmp.lt.u32.totalorder %s2614_s27, %s3195_s2 }
   0x7   :  { %p2620_p2 = pnand %p2618_p1, %p2615_p0 }
   0x9   :  { %2623 = shalt.err (!%p2620_p2)
}
   0xa   :  { %s2624_s5 = scalar_lea.vmem %s24_s24, 8192  ;;  %p2629_p4 = scmp.lt.s32.totalorder %s24_s24, %s24_s24 }
   0xb   :  { %p2625_p3 = scmp.ne.s32.totalorder %s24_s24, %s2624_s5  ;;  %p2630_p5 = scmp.lt.s32.totalorder %s2624_s5, %s2624_s5 }
   0xd   :  { %p2631_p6 = por %p2630_p5, %p2629_p4 }
   0xf   :  { %p2632_p7 = pnand %p2631_p6, %p2625_p3 }
  0x11   :  { %2635 = shalt.err (!%p2632_p7)
}
  0x12   :  { %s2639_s8 = smov 512   ;;  %s2640_s9 = smov 32  }
  0x13   :  { %29 = dma.hbm_to_vmem [thread:$0]  %s3195_s2, 8192, %s24_s24, [#allocation4], %s2639_s8, %s2639_s8, %s2640_s9  }
  0x14   :  { %2636 = dma.done.wait [#allocation4], 8192  }
  0x15   :  { %2637 = vsyncadd [#allocation4], 4294959104  ;;  %v2641_v1 = vmov 0.0   ;;  %v42_v2 = vld [vmem:[%s3194_s1 + $0x8] sm:$0xff]  ;;  %v41_v3 = vld [vmem:[%s3194_s1] sm:$0xff]  ;;  %vm67_vm0 = vcmask 64512  }
  0x16   :  { %138 = vmatprep.mubr.f32.mxu1 %v2641_v1  ;;  %356 = vmatprep.mubr.f32.mxu0 %v2641_v1  ;;  %v39_v4 = vld [vmem:[%s3193_s0] sm:$0xff]  ;;  %v229_v5 = vld [vmem:[#allocation3 + $0x8] sm:$0xff]  ;;  %v44_v14 = vld [vmem:[%s3194_s1 + $0x18] sm:$0xff]  ;;  %vm2643_vm1 = vmmov 0   ;;  %vm1856_vm2 = vcmask 1024  }
  0x17   :  { %74 = vmatprep.subr.mxu1 %v42_v2  ;;  %v233_v6 = vld [vmem:[#allocation3 + $0x28] sm:$0xff]  ;;  %v228_v7 = vld [vmem:[#allocation3] sm:$0xff]  ;;  %v231_v19 = vld [vmem:[#allocation3 + $0x18] sm:$0xff] }
  0x18   :  { %75 = vmatpush1.msra.mxu1 %v41_v3  ;;  %v2705_v8 = vpack.c.bf16 %v233_v6, %v229_v5  ;;  %v232_v9 = vld [vmem:[#allocation3 + $0x20] sm:$0xff]  ;;  %v237_v11 = vld [vmem:[#allocation3 + $0x48] sm:$0xff]  ;;  %v235_v21 = vld [vmem:[#allocation3 + $0x38] sm:$0xff] }
  0x19   :  { %v2710_v10 = vld [vmem:[%s3193_s0 + $0x8] sm:$0xff]  ;;  %1863 = vmatmul.mubr.msk.f32.vlgmr.msra.gmra.mrb[0].mxu1 %vm67_vm0, %v39_v4  ;;  %v2713_v12 = vpack.c.bf16 %v232_v9, %v228_v7  ;;  %v43_v18 = vld [vmem:[%s3194_s1 + $0x10] sm:$0xff]  ;;  %151 = vmatprep.subr.mxu1 %v44_v14  ;;  %v2729_v24 = vpack.c.bf16 %v235_v21, %v231_v19  ;;  %v239_v30 = vld [vmem:[#allocation3 + $0x58] sm:$0xff] }
  0x1a   :  { %v241_v13 = vld [vmem:[#allocation3 + $0x68] sm:$0xff]  ;;  %v236_v15 = vld [vmem:[#allocation3 + $0x40] sm:$0xff]  ;;  %1945 = vmatprep.subr.bf16.mxu0 %v2705_v8  ;;  %144 = vmatprep.mubr.f32.mxu1 %v2641_v1  ;;  %v230_v26 = vld [vmem:[#allocation3 + $0x10] sm:$0xff] }
  0x1b   :  { %v2720_v16 = vpack.c.bf16 %v241_v13, %v237_v11  ;;  %v240_v17 = vld [vmem:[#allocation3 + $0x60] sm:$0xff]  ;;  %1947 = vmatpush1.bf16.msra.mxu0 %v2713_v12  ;;  %v245_v22 = vld [vmem:[#allocation3 + $0x88] sm:$0xff]  ;;  %152 = vmatpush1.msra.mxu1 %v43_v18  ;;  %v234_v27 = vld [vmem:[#allocation3 + $0x30] sm:$0xff] }
  0x1c   :  { %v2726_v20 = vpack.c.bf16 %v240_v17, %v236_v15  ;;  %v249_v23 = vld [vmem:[#allocation3 + $0xa8] sm:$0xff]  ;;  %v244_v28 = vld [vmem:[#allocation3 + $0x80] sm:$0xff]  ;;  %v243_v31 = vld [vmem:[#allocation3 + $0x78] sm:$0xff]  ;;  %1977 = vmatprep.subr.bf16.mxu1 %v2729_v24  ;;  %v2737_v32 = vpack.c.bf16 %v234_v27, %v230_v26 }
  0x1d   :  { %1949 = vmatprep.subr.bf16.mxu0 %v2720_v16  ;;  %v2731_v25 = vpack.c.bf16 %v249_v23, %v245_v22  ;;  %1864 = vmatmul.mubr.msk.f32.gmra.mrb[2].mxu1 %vm67_vm0, %v2710_v10  ;;  %v248_v29 = vld [vmem:[#allocation3 + $0xa0] sm:$0xff]  ;;  %v253_v33 = vld [vmem:[#allocation3 + $0xc8] sm:$0xff]  ;;  %v2742_v36 = vpack.c.bf16 %v243_v31, %v239_v30  ;;  %v238_v37 = vld [vmem:[#allocation3 + $0x50] sm:$0xff] }
  0x1e   :  { %215 = vmatprep.mubr.f32.mxu1 %v2641_v1  ;;  %v257_v34 = vld [vmem:[#allocation3 + $0xe8] sm:$0xff]  ;;  %v2740_v35 = vpack.c.bf16 %v248_v29, %v244_v28  ;;  %v242_v38 = vld [vmem:[#allocation3 + $0x70] sm:$0xff]  ;;  %v252_v39 = vld [vmem:[#allocation3 + $0xc0] sm:$0xff] }
  0x1f   :  { %1951 = vmatpush1.bf16.msra.mxu0 %v2726_v20  ;;  %v2745_v40 = vpack.c.bf16 %v257_v34, %v253_v33  ;;  %v256_v41 = vld [vmem:[#allocation3 + $0xe0] sm:$0xff]  ;;  %v247_v42 = vld [vmem:[#allocation3 + $0x98] sm:$0xff]  ;;  %v261_v44 = vld [vmem:[#allocation3 + $0x108] sm:$0xff]  ;;  %v2749_v46 = vpack.c.bf16 %v242_v38, %v238_v37 }
  0x20   :  { %1953 = vmatprep.subr.bf16.mxu0 %v2731_v25  ;;  %v251_v43 = vld [vmem:[#allocation3 + $0xb8] sm:$0xff]  ;;  %v265_v45 = vld [vmem:[#allocation3 + $0x128] sm:$0xff]  ;;  %v2754_v47 = vpack.c.bf16 %v256_v41, %v252_v39  ;;  %v246_v49 = vld [vmem:[#allocation3 + $0x90] sm:$0xff] }
  0x21   :  { %1865 = vmatmul.mubr.msk.f32.vlgmr.msra.gmra.mrb[4].mxu1 %vm67_vm0, %v39_v4  ;;  %v2756_v48 = vpack.c.bf16 %v251_v43, %v247_v42  ;;  %v250_v50 = vld [vmem:[#allocation3 + $0xb0] sm:$0xff]  ;;  %v260_v51 = vld [vmem:[#allocation3 + $0x100] sm:$0xff]  ;;  %v2759_v52 = vpack.c.bf16 %v265_v45, %v261_v44  ;;  %v255_v54 = vld [vmem:[#allocation3 + $0xd8] sm:$0xff] }
  0x22   :  { %1979 = vmatpush1.bf16.msra.mxu1 %v2737_v32  ;;  %221 = vmatprep.mubr.f32.mxu1 %v2641_v1  ;;  %v264_v53 = vld [vmem:[#allocation3 + $0x120] sm:$0xff]  ;;  %v259_v55 = vld [vmem:[#allocation3 + $0xf8] sm:$0xff]  ;;  %v269_v56 = vld [vmem:[#allocation3 + $0x148] sm:$0xff]  ;;  %v2764_v58 = vpack.c.bf16 %v250_v50, %v246_v49 }
  0x23   :  { %1955 = vmatpush1.bf16.msra.mxu0 %v2740_v35  ;;  %1981 = vmatprep.subr.bf16.mxu1 %v2742_v36  ;;  %v273_v57 = vld [vmem:[#allocation3 + $0x168] sm:$0xff]  ;;  %v2769_v59 = vpack.c.bf16 %v264_v53, %v260_v51  ;;  %v2771_v60 = vpack.c.bf16 %v259_v55, %v255_v54  ;;  %v254_v61 = vld [vmem:[#allocation3 + $0xd0] sm:$0xff]  ;;  %v268_v63 = vld [vmem:[#allocation3 + $0x140] sm:$0xff]  ;;  %v47_v55 = vlaneseq }
  0x24   :  { %1957 = vmatprep.subr.bf16.mxu0 %v2745_v40  ;;  %v258_v62 = vld [vmem:[#allocation3 + $0xf0] sm:$0xff]  ;;  %v2774_v0 = vpack.c.bf16 %v273_v57, %v269_v56  ;;  %v272_v2 = vld [vmem:[#allocation3 + $0x160] sm:$0xff]  ;;  %v263_v3 = vld [vmem:[#allocation3 + $0x118] sm:$0xff] }
  0x25   :  { %1866 = vmatmul.mubr.msk.f32.gmra.mrb[6].mxu1 %vm67_vm0, %v2710_v10  ;;  %v267_v4 = vld [vmem:[#allocation3 + $0x138] sm:$0xff]  ;;  %v277_v5 = vld [vmem:[#allocation3 + $0x188] sm:$0xff]  ;;  %v2777_v7 = vpack.c.bf16 %v258_v62, %v254_v61  ;;  %v2781_v9 = vpack.c.bf16 %v272_v2, %v268_v63  ;;  %v262_v11 = vld [vmem:[#allocation3 + $0x110] sm:$0xff]  ;;  %v48_v56 = vshrl.u32 %v47_v55, 7 }
  0x26   :  { %1983 = vmatpush1.bf16.msra.mxu1 %v2749_v46  ;;  %427 = vmatprep.mubr.f32.mxu1 %v2641_v1  ;;  %v281_v6 = vld [vmem:[#allocation3 + $0x1a8] sm:$0xff]  ;;  %v2783_v10 = vpack.c.bf16 %v267_v4, %v263_v3  ;;  %v266_v13 = vld [vmem:[#allocation3 + $0x130] sm:$0xff]  ;;  %v276_v14 = vld [vmem:[#allocation3 + $0x180] sm:$0xff] }
  0x27   :  { %1959 = vmatpush1.bf16.msra.mxu0 %v2754_v47  ;;  %1985 = vmatprep.subr.bf16.mxu1 %v2756_v48  ;;  %v2786_v15 = vpack.c.bf16 %v281_v6, %v277_v5  ;;  %v280_v17 = vld [vmem:[#allocation3 + $0x1a0] sm:$0xff]  ;;  %v271_v18 = vld [vmem:[#allocation3 + $0x158] sm:$0xff]  ;;  %v285_v21 = vld [vmem:[#allocation3 + $0x1c8] sm:$0xff]  ;;  %v2789_v23 = vpack.c.bf16 %v266_v13, %v262_v11  ;;  %v49_v57 = vsub.s32 0, %v48_v56  ;;  %v53_v63 = vsub.s32 1, %v48_v56 }
  0x28   :  { %1961 = vmatprep.subr.bf16.mxu0 %v2759_v52  ;;  %v275_v19 = vld [vmem:[#allocation3 + $0x178] sm:$0xff]  ;;  %v289_v22 = vld [vmem:[#allocation3 + $0x1e8] sm:$0xff]  ;;  %v2793_v26 = vpack.c.bf16 %v280_v17, %v276_v14  ;;  %v270_v28 = vld [vmem:[#allocation3 + $0x150] sm:$0xff]  ;;  %v57_v14 = vsub.s32 2, %v48_v56 }
  0x29   :  { %v2795_v27 = vpack.c.bf16 %v275_v19, %v271_v18  ;;  %v274_v29 = vld [vmem:[#allocation3 + $0x170] sm:$0xff]  ;;  %v284_v30 = vld [vmem:[#allocation3 + $0x1c0] sm:$0xff]  ;;  %v2798_v31 = vpack.c.bf16 %v289_v22, %v285_v21  ;;  %v279_v34 = vld [vmem:[#allocation3 + $0x198] sm:$0xff]  ;;  %v61_v18 = vsub.s32 3, %v48_v56 }
  0x2a   :  { %1987 = vmatpush1.bf16.msra.mxu1 %v2764_v58  ;;  %v288_v33 = vld [vmem:[#allocation3 + $0x1e0] sm:$0xff]  ;;  %v283_v37 = vld [vmem:[#allocation3 + $0x1b8] sm:$0xff]  ;;  %v2801_v38 = vpack.c.bf16 %v274_v29, %v270_v28  ;;  %v278_v42 = vld [vmem:[#allocation3 + $0x190] sm:$0xff] }
  0x2b   :  { %1963 = vmatpush1.bf16.msra.mxu0 %v2769_v59  ;;  %1989 = vmatprep.subr.bf16.mxu1 %v2771_v60  ;;  %v2805_v39 = vpack.c.bf16 %v288_v33, %v284_v30  ;;  %v2807_v41 = vpack.c.bf16 %v283_v37, %v279_v34  ;;  %v282_v43 = vld [vmem:[#allocation3 + $0x1b0] sm:$0xff]  ;;  %v287_v44 = vld [vmem:[#allocation3 + $0x1d8] sm:$0xff] }
  0x2c   :  { %1965 = vmatprep.subr.bf16.mxu0 %v2774_v0  ;;  %v291_v45 = vld [vmem:[#allocation3 + $0x1f8] sm:$0xff]  ;;  %v2811_v49 = vpack.c.bf16 %v282_v43, %v278_v42  ;;  %v286_v51 = vld [vmem:[#allocation3 + $0x1d0] sm:$0xff] }
  0x2d   :  { %v2815_v50 = vpack.c.bf16 %v291_v45, %v287_v44  ;;  %v290_v53 = vld [vmem:[#allocation3 + $0x1f0] sm:$0xff]  ;;  %v45_v61 = vld [vmem:[%s3196_s3] sm:$0xf] }
  0x2e   :  { %1991 = vmatpush1.bf16.msra.mxu1 %v2777_v7  ;;  %v2820_v54 = vpack.c.bf16 %v290_v53, %v286_v51  ;;  %v50_v3 = vrot.slane %v45_v61, %v49_v57  ;;  %v54_v4 = vrot.slane %v45_v61, %v53_v63  ;;  %v58_v21 = vrot.slane %v45_v61, %v57_v14 }
  0x2f   :  { %1967 = vmatpush1.bf16.msra.mxu0 %v2781_v9  ;;  %1993 = vmatprep.subr.bf16.mxu1 %v2783_v10  ;;  %v62_v22 = vrot.slane %v45_v61, %v61_v18 }
  0x30   :  { %1969 = vmatprep.subr.bf16.mxu0 %v2786_v15 }
  0x32   :  { %1995 = vmatpush1.bf16.msra.mxu1 %v2789_v23 }
  0x33   :  { %1971 = vmatpush1.bf16.msra.mxu0 %v2793_v26  ;;  %1997 = vmatprep.subr.bf16.mxu1 %v2795_v27 }
  0x34   :  { %1973 = vmatprep.subr.bf16.mxu0 %v2798_v31 }
  0x36   :  { %1999 = vmatpush1.bf16.msra.mxu1 %v2801_v38 }
  0x37   :  { %1975 = vmatpush1.bf16.msra.mxu0 %v2805_v39  ;;  %2001 = vmatprep.subr.bf16.mxu1 %v2807_v41 }
  0x38   :  { %2009 = vmatprep.subr.bf16.mxu0 %v2705_v8 }
  0x3a   :  { %357 = vmatmul.mubr.f32.vlgmr.msra.gmra.mrb[0].mxu0 %v2641_v1  ;;  %2003 = vmatpush1.bf16.msra.mxu1 %v2811_v49 }
  0x3b   :  { %2005 = vmatprep.subr.bf16.mxu1 %v2815_v50  ;;  %2011 = vmatpush1.bf16.msra.mxu0 %v2713_v12 }
  0x3c   :  { %2013 = vmatprep.subr.bf16.mxu0 %v2720_v16  ;;  %526 = vmatprep.mubr.f32.mxu0 %v2641_v1 }
  0x3e   :  { %2007 = vmatpush1.bf16.msra.mxu1 %v2820_v54 }
  0x3f   :  { %2041 = vmatprep.subr.bf16.mxu1 %v2729_v24  ;;  %2015 = vmatpush1.bf16.msra.mxu0 %v2726_v20 }
  0x40   :  { %2017 = vmatprep.subr.bf16.mxu0 %v2731_v25 }
  0x41   :  { %428 = vmatmul.mubr.f32.vlgmr.msra.gmra.mrb[8].mxu1 %v2641_v1 }
  0x42   :  { %2043 = vmatpush1.bf16.msra.mxu1 %v2737_v32  ;;  %597 = vmatprep.mubr.f32.mxu1 %v2641_v1 }
  0x43   :  { %2045 = vmatprep.subr.bf16.mxu1 %v2742_v36  ;;  %2019 = vmatpush1.bf16.msra.mxu0 %v2740_v35 }
  0x44   :  { %2021 = vmatprep.subr.bf16.mxu0 %v2745_v40 }
  0x46   :  { %2047 = vmatpush1.bf16.msra.mxu1 %v2749_v46 }
  0x47   :  { %2049 = vmatprep.subr.bf16.mxu1 %v2756_v48  ;;  %2023 = vmatpush1.bf16.msra.mxu0 %v2754_v47 }
  0x48   :  { %2025 = vmatprep.subr.bf16.mxu0 %v2759_v52 }
  0x4a   :  { %2051 = vmatpush1.bf16.msra.mxu1 %v2764_v58 }
  0x4b   :  { %2053 = vmatprep.subr.bf16.mxu1 %v2771_v60  ;;  %2027 = vmatpush1.bf16.msra.mxu0 %v2769_v59 }
  0x4c   :  { %2029 = vmatprep.subr.bf16.mxu0 %v2774_v0 }
  0x4e   :  { %2055 = vmatpush1.bf16.msra.mxu1 %v2777_v7 }
  0x4f   :  { %2057 = vmatprep.subr.bf16.mxu1 %v2783_v10  ;;  %2031 = vmatpush1.bf16.msra.mxu0 %v2781_v9 }
  0x50   :  { %2033 = vmatprep.subr.bf16.mxu0 %v2786_v15 }
  0x52   :  { %2059 = vmatpush1.bf16.msra.mxu1 %v2789_v23 }
  0x53   :  { %2061 = vmatprep.subr.bf16.mxu1 %v2795_v27  ;;  %2035 = vmatpush1.bf16.msra.mxu0 %v2793_v26 }
  0x54   :  { %2037 = vmatprep.subr.bf16.mxu0 %v2798_v31 }
  0x56   :  { %2063 = vmatpush1.bf16.msra.mxu1 %v2801_v38 }
  0x57   :  { %2065 = vmatprep.subr.bf16.mxu1 %v2807_v41  ;;  %2039 = vmatpush1.bf16.msra.mxu0 %v2805_v39 }
  0x58   :  { %2073 = vmatprep.subr.bf16.mxu0 %v2705_v8 }
  0x5a   :  { %2067 = vmatpush1.bf16.msra.mxu1 %v2811_v49 }
  0x5b   :  { %2069 = vmatprep.subr.bf16.mxu1 %v2815_v50 }
  0x5e   :  { %2071 = vmatpush1.bf16.msra.mxu1 %v2820_v54 }
  0x5f   :  { %2105 = vmatprep.subr.bf16.mxu1 %v2729_v24 }
  0xec   :  { %v140_v62 = vpop.f32.mrb[0].mxu1 }
  0xed   :  { %v142_v2 = vpop.f32.mrb[1].mxu1  ;;  %v2871_v34 = vadd.f32 %v140_v62, %v50_v3 }
  0xee   :  { %v2873_v37 = vadd.f32 %v142_v2, %v54_v4 }
  0xf0   :  { %v146_v5 = vpop.f32.mrb[2].mxu1 }
  0xf1   :  { %v2863_v6 = vadd.f32 %v146_v5, %v50_v3  ;;  %v148_v11 = vpop.f32.mrb[3].mxu1 }
  0xf2   :  { %v2865_v13 = vadd.f32 %v148_v11, %v54_v4 }
  0xf4   :  { %v217_v17 = vpop.f32.mrb[4].mxu1 }
  0xf5   :  { %v219_v19 = vpop.f32.mrb[5].mxu1  ;;  %v2880_v62 = vadd.f32 %v217_v17, %v58_v21 }
  0xf6   :  { %v2877_v55 = vadd.f32 %v219_v19, %v62_v22 }
  0xf8   :  { %v223_v28 = vpop.f32.mrb[6].mxu1 }
  0xf9   :  { %v2867_v29 = vadd.f32 %v223_v28, %v58_v21  ;;  %v225_v30 = vpop.f32.mrb[7].mxu1 }
  0xfa   :  { %v2869_v33 = vadd.f32 %v225_v30, %v62_v22 }
 0x10d   :  { %v358_v42 = vpop.f32.mrb[0].mxu0 }
 0x10e   :  { %v434_v43 = vadd.f32 %v358_v42, %v2871_v34  ;;  %v360_v44 = vpop.f32.mrb[1].mxu0 }
 0x10f   :  { %v435_v45 = vadd.f32 %v360_v44, %v2873_v37 }
 0x110   :  { %v1867_v51 = vmul.f32 -1.442695, %v434_v43 }
 0x111   :  { %v1868_v53 = vmul.f32 -1.442695, %v435_v45 }
 0x112   :  { %2486 = vpow2.f32 %v1867_v51 }
 0x113   :  { %2488 = vpow2.f32 %v1868_v53 }
 0x114   :  { %v429_v56 = vpop.f32.mrb[8].mxu1 }
 0x115   :  { %v431_v57 = vpop.f32.mrb[9].mxu1  ;;  %v436_v2 = vadd.f32 %v429_v56, %v2880_v62 }
 0x116   :  { %v437_v61 = vadd.f32 %v431_v57, %v2877_v55 }
 0x118   :  { %v1869_v63 = vmul.f32 -1.442695, %v437_v61 }
 0x11a   :  { %2490 = vpow2.f32 %v1869_v63 }
 0x11b   :  { %2492 = vtanh.f32 %v436_v2 }
 0x11c   :  { %v2487_v3 = vpop.eup %2486 }
 0x11d   :  { %v2489_v4 = vpop.eup %2488  ;;  %v441_v5 = vadd.f32 1.0, %v2487_v3 }
 0x11e   :  { %v447_v11 = vadd.f32 1.0, %v2489_v4 }
 0x11f   :  { %2494 = vrcp.f32 %v441_v5 }
 0x120   :  { %2496 = vrcp.f32 %v447_v11 }
 0x124   :  { %v2491_v14 = vpop.eup %2490 }
 0x125   :  { %v2493_v18 = vpop.eup %2492  ;;  %v454_v30 = vadd.f32 1.0, %v2491_v14 }
 0x127   :  { %2498 = vrcp.f32 %v454_v30 }
 0x129   :  { %v2495_v19 = vpop.eup %2494 }
 0x12a   :  { %v2497_v22 = vpop.eup %2496  ;;  %v458_v28 = vmul.f32 %v2495_v19, %v2493_v18 }
 0x12b   :  { %v457_v42 = vmul.f32 0.0, %v2497_v22 }
 0x12d   :  { %v2883_v17 = vadd.f32 %v458_v28, %v457_v42 }
 0x12f   :  { %2500 = vtanh.f32 %v2883_v17 }
 0x131   :  { %v2499_v21 = vpop.eup %2498 }
 0x139   :  { %v2501_v43 = vpop.eup %2500 }
 0x13a   :  { %v461_v44 = vmul.f32 %v2501_v43, %v2499_v21 }
 0x13c   :  { %527 = vmatmul.mubr.f32.vlgmr.msra.gmra.mrb[2].mxu0 %v461_v44  ;;  %598 = vmatmul.mubr.f32.vlgmr.msra.gmra.mrb[10].mxu1 %v461_v44 }
 0x13d   :  { %2075 = vmatpush1.bf16.msra.mxu0 %v2713_v12  ;;  %2107 = vmatpush1.bf16.msra.mxu1 %v2737_v32 }
 0x13e   :  { %2077 = vmatprep.subr.bf16.mxu0 %v2720_v16  ;;  %2109 = vmatprep.subr.bf16.mxu1 %v2742_v36 }
 0x13f   :  { %714 = vmatprep.mubr.f32.mxu0 %v2641_v1  ;;  %785 = vmatprep.mubr.f32.mxu1 %v2641_v1 }
 0x141   :  { %2079 = vmatpush1.bf16.msra.mxu0 %v2726_v20  ;;  %2111 = vmatpush1.bf16.msra.mxu1 %v2749_v46 }
 0x142   :  { %2081 = vmatprep.subr.bf16.mxu0 %v2731_v25  ;;  %2113 = vmatprep.subr.bf16.mxu1 %v2756_v48 }
 0x145   :  { %2083 = vmatpush1.bf16.msra.mxu0 %v2740_v35  ;;  %2115 = vmatpush1.bf16.msra.mxu1 %v2764_v58 }
 0x146   :  { %2085 = vmatprep.subr.bf16.mxu0 %v2745_v40  ;;  %2117 = vmatprep.subr.bf16.mxu1 %v2771_v60 }
 0x149   :  { %2087 = vmatpush1.bf16.msra.mxu0 %v2754_v47  ;;  %2119 = vmatpush1.bf16.msra.mxu1 %v2777_v7 }
 0x14a   :  { %2089 = vmatprep.subr.bf16.mxu0 %v2759_v52  ;;  %2121 = vmatprep.subr.bf16.mxu1 %v2783_v10 }
 0x14d   :  { %2091 = vmatpush1.bf16.msra.mxu0 %v2769_v59  ;;  %2123 = vmatpush1.bf16.msra.mxu1 %v2789_v23 }
 0x14e   :  { %2093 = vmatprep.subr.bf16.mxu0 %v2774_v0  ;;  %2125 = vmatprep.subr.bf16.mxu1 %v2795_v27 }
 0x151   :  { %2095 = vmatpush1.bf16.msra.mxu0 %v2781_v9  ;;  %2127 = vmatpush1.bf16.msra.mxu1 %v2801_v38 }
 0x152   :  { %2097 = vmatprep.subr.bf16.mxu0 %v2786_v15  ;;  %2129 = vmatprep.subr.bf16.mxu1 %v2807_v41 }
 0x155   :  { %2099 = vmatpush1.bf16.msra.mxu0 %v2793_v26  ;;  %2131 = vmatpush1.bf16.msra.mxu1 %v2811_v49 }
 0x156   :  { %2101 = vmatprep.subr.bf16.mxu0 %v2798_v31  ;;  %2133 = vmatprep.subr.bf16.mxu1 %v2815_v50 }
 0x159   :  { %2103 = vmatpush1.bf16.msra.mxu0 %v2805_v39  ;;  %2135 = vmatpush1.bf16.msra.mxu1 %v2820_v54 }
 0x15a   :  { %2137 = vmatprep.subr.bf16.mxu0 %v2705_v8  ;;  %2169 = vmatprep.subr.bf16.mxu1 %v2729_v24 }
 0x20f   :  { %v528_v45 = vpop.f32.mrb[2].mxu0  ;;  %v599_v51 = vpop.f32.mrb[10].mxu1 }
 0x210   :  { %v608_v53 = vrot.slane %v528_v45, 6  ;;  %v530_v56 = vpop.f32.mrb[3].mxu0  ;;  %v601_v57 = vpop.f32.mrb[11].mxu1  ;;  %v610_v14 = vrot.slane %v599_v51, 6  ;;  %v640_v45 = vrot.slane %v2883_v17, 6 }
 0x211   :  { %v609_v61 = vrot.slane %v530_v56, 6  ;;  %v611_v5 = vrot.slane %v601_v57, 6 }
 0x212   :  { %v616_v63 = vadd.f32 %v608_v53, %v2871_v34  ;;  %v618_v19 = vadd.f32 %v610_v14, %v2880_v62 }
 0x213   :  { %v617_v2 = vadd.f32 %v609_v61, %v2873_v37  ;;  %v619_v11 = vadd.f32 %v611_v5, %v2877_v55 }
 0x214   :  { %v1870_v3 = vmul.f32 -1.442695, %v616_v63 }
 0x215   :  { %v1871_v4 = vmul.f32 -1.442695, %v617_v2  ;;  %v1872_v18 = vmul.f32 -1.442695, %v619_v11 }
 0x216   :  { %2502 = vpow2.f32 %v1870_v3 }
 0x217   :  { %2504 = vpow2.f32 %v1871_v4 }
 0x218   :  { %2506 = vpow2.f32 %v1872_v18 }
 0x219   :  { %2508 = vtanh.f32 %v618_v19 }
 0x220   :  { %v2503_v22 = vpop.eup %2502 }
 0x221   :  { %v2505_v28 = vpop.eup %2504  ;;  %v623_v30 = vadd.f32 1.0, %v2503_v22 }
 0x222   :  { %v629_v42 = vadd.f32 1.0, %v2505_v28  ;;  %v2507_v21 = vpop.eup %2506 }
 0x223   :  { %2510 = vrcp.f32 %v623_v30  ;;  %v2509_v43 = vpop.eup %2508  ;;  %v636_v57 = vadd.f32 1.0, %v2507_v21 }
 0x224   :  { %2512 = vrcp.f32 %v629_v42 }
 0x225   :  { %2514 = vrcp.f32 %v636_v57 }
 0x22d   :  { %v2511_v44 = vpop.eup %2510 }
 0x22e   :  { %v2513_v53 = vpop.eup %2512  ;;  %v643_v56 = vmul.f32 %v2511_v44, %v2509_v43 }
 0x22f   :  { %v642_v51 = vmul.f32 %v2513_v53, %v640_v45  ;;  %v2515_v63 = vpop.eup %2514 }
 0x231   :  { %v2925_v61 = vadd.f32 %v643_v56, %v642_v51 }
 0x233   :  { %2516 = vtanh.f32 %v2925_v61 }
 0x23d   :  { %v2517_v2 = vpop.eup %2516 }
 0x23e   :  { %v646_v3 = vmul.f32 %v2517_v2, %v2515_v63 }
 0x240   :  { %v648_v4 = vrot.slane %v646_v3, 2 }
 0x242   :  { %715 = vmatmul.mubr.f32.vlgmr.msra.gmra.mrb[4].mxu0 %v648_v4  ;;  %786 = vmatmul.mubr.f32.vlgmr.msra.gmra.mrb[12].mxu1 %v648_v4 }
 0x243   :  { %2139 = vmatpush1.bf16.msra.mxu0 %v2713_v12  ;;  %2171 = vmatpush1.bf16.msra.mxu1 %v2737_v32 }
 0x244   :  { %2141 = vmatprep.subr.bf16.mxu0 %v2720_v16  ;;  %2173 = vmatprep.subr.bf16.mxu1 %v2742_v36 }
 0x245   :  { %902 = vmatprep.mubr.f32.mxu0 %v2641_v1  ;;  %973 = vmatprep.mubr.f32.mxu1 %v2641_v1 }
 0x247   :  { %2143 = vmatpush1.bf16.msra.mxu0 %v2726_v20  ;;  %2175 = vmatpush1.bf16.msra.mxu1 %v2749_v46 }
 0x248   :  { %2145 = vmatprep.subr.bf16.mxu0 %v2731_v25  ;;  %2177 = vmatprep.subr.bf16.mxu1 %v2756_v48 }
 0x24b   :  { %2147 = vmatpush1.bf16.msra.mxu0 %v2740_v35  ;;  %2179 = vmatpush1.bf16.msra.mxu1 %v2764_v58 }
 0x24c   :  { %2149 = vmatprep.subr.bf16.mxu0 %v2745_v40  ;;  %2181 = vmatprep.subr.bf16.mxu1 %v2771_v60 }
 0x24f   :  { %2151 = vmatpush1.bf16.msra.mxu0 %v2754_v47  ;;  %2183 = vmatpush1.bf16.msra.mxu1 %v2777_v7 }
 0x250   :  { %2153 = vmatprep.subr.bf16.mxu0 %v2759_v52  ;;  %2185 = vmatprep.subr.bf16.mxu1 %v2783_v10 }
 0x253   :  { %2155 = vmatpush1.bf16.msra.mxu0 %v2769_v59  ;;  %2187 = vmatpush1.bf16.msra.mxu1 %v2789_v23 }
 0x254   :  { %2157 = vmatprep.subr.bf16.mxu0 %v2774_v0  ;;  %2189 = vmatprep.subr.bf16.mxu1 %v2795_v27 }
 0x257   :  { %2159 = vmatpush1.bf16.msra.mxu0 %v2781_v9  ;;  %2191 = vmatpush1.bf16.msra.mxu1 %v2801_v38 }
 0x258   :  { %2161 = vmatprep.subr.bf16.mxu0 %v2786_v15  ;;  %2193 = vmatprep.subr.bf16.mxu1 %v2807_v41 }
 0x25b   :  { %2163 = vmatpush1.bf16.msra.mxu0 %v2793_v26  ;;  %2195 = vmatpush1.bf16.msra.mxu1 %v2811_v49 }
 0x25c   :  { %2165 = vmatprep.subr.bf16.mxu0 %v2798_v31  ;;  %2197 = vmatprep.subr.bf16.mxu1 %v2815_v50 }
 0x25f   :  { %2167 = vmatpush1.bf16.msra.mxu0 %v2805_v39  ;;  %2199 = vmatpush1.bf16.msra.mxu1 %v2820_v54 }
 0x260   :  { %2201 = vmatprep.subr.bf16.mxu0 %v2705_v8  ;;  %2233 = vmatprep.subr.bf16.mxu1 %v2729_v24 }
 0x315   :  { %v716_v17 = vpop.f32.mrb[4].mxu0  ;;  %v787_v5 = vpop.f32.mrb[12].mxu1 }
 0x316   :  { %v796_v11 = vrot.slane %v716_v17, 4  ;;  %v718_v14 = vpop.f32.mrb[5].mxu0  ;;  %v789_v18 = vpop.f32.mrb[13].mxu1  ;;  %v798_v44 = vrot.slane %v787_v5, 4  ;;  %v828_v17 = vrot.slane %v2925_v61, 6 }
 0x317   :  { %v797_v19 = vrot.slane %v718_v14, 4  ;;  %v799_v21 = vrot.slane %v789_v18, 4 }
 0x318   :  { %v804_v22 = vadd.f32 %v796_v11, %v2871_v34  ;;  %v806_v53 = vadd.f32 %v798_v44, %v2880_v62 }
 0x319   :  { %v805_v28 = vadd.f32 %v797_v19, %v2873_v37  ;;  %v807_v43 = vadd.f32 %v799_v21, %v2877_v55 }
 0x31a   :  { %v1873_v30 = vmul.f32 -1.442695, %v804_v22 }
 0x31b   :  { %v1874_v42 = vmul.f32 -1.442695, %v805_v28  ;;  %v1875_v45 = vmul.f32 -1.442695, %v807_v43 }
 0x31c   :  { %2518 = vpow2.f32 %v1873_v30 }
 0x31d   :  { %2520 = vpow2.f32 %v1874_v42 }
 0x31e   :  { %2522 = vpow2.f32 %v1875_v45 }
 0x31f   :  { %2524 = vtanh.f32 %v806_v53 }
 0x326   :  { %v2519_v56 = vpop.eup %2518 }
 0x327   :  { %v2521_v57 = vpop.eup %2520  ;;  %v811_v51 = vadd.f32 1.0, %v2519_v56 }
 0x328   :  { %v817_v63 = vadd.f32 1.0, %v2521_v57  ;;  %v2523_v2 = vpop.eup %2522 }
 0x329   :  { %2526 = vrcp.f32 %v811_v51  ;;  %v2525_v3 = vpop.eup %2524  ;;  %v824_v18 = vadd.f32 1.0, %v2523_v2 }
 0x32a   :  { %2528 = vrcp.f32 %v817_v63 }
 0x32b   :  { %2530 = vrcp.f32 %v824_v18 }
 0x333   :  { %v2527_v4 = vpop.eup %2526 }
 0x334   :  { %v2529_v11 = vpop.eup %2528  ;;  %v831_v14 = vmul.f32 %v2527_v4, %v2525_v3 }
 0x335   :  { %v830_v5 = vmul.f32 %v2529_v11, %v828_v17  ;;  %v2531_v22 = vpop.eup %2530 }
 0x337   :  { %v2967_v19 = vadd.f32 %v831_v14, %v830_v5 }
 0x339   :  { %2532 = vtanh.f32 %v2967_v19 }
 0x343   :  { %v2533_v28 = vpop.eup %2532 }
 0x344   :  { %v834_v30 = vmul.f32 %v2533_v28, %v2531_v22 }
 0x346   :  { %v836_v42 = vrot.slane %v834_v30, 4  ;;  %v1016_v30 = vrot.slane %v2967_v19, 6 }
 0x348   :  { %903 = vmatmul.mubr.f32.vlgmr.msra.gmra.mrb[6].mxu0 %v836_v42  ;;  %974 = vmatmul.mubr.f32.vlgmr.msra.gmra.mrb[14].mxu1 %v836_v42 }
 0x349   :  { %2203 = vmatpush1.bf16.msra.mxu0 %v2713_v12  ;;  %2235 = vmatpush1.bf16.msra.mxu1 %v2737_v32 }
 0x34a   :  { %2205 = vmatprep.subr.bf16.mxu0 %v2720_v16  ;;  %2237 = vmatprep.subr.bf16.mxu1 %v2742_v36 }
 0x34b   :  { %1090 = vmatprep.mubr.f32.mxu0 %v2641_v1  ;;  %1161 = vmatprep.mubr.f32.mxu1 %v2641_v1 }
 0x34d   :  { %2207 = vmatpush1.bf16.msra.mxu0 %v2726_v20  ;;  %2239 = vmatpush1.bf16.msra.mxu1 %v2749_v46 }
 0x34e   :  { %2209 = vmatprep.subr.bf16.mxu0 %v2731_v25  ;;  %2241 = vmatprep.subr.bf16.mxu1 %v2756_v48 }
 0x351   :  { %2211 = vmatpush1.bf16.msra.mxu0 %v2740_v35  ;;  %2243 = vmatpush1.bf16.msra.mxu1 %v2764_v58 }
 0x352   :  { %2213 = vmatprep.subr.bf16.mxu0 %v2745_v40  ;;  %2245 = vmatprep.subr.bf16.mxu1 %v2771_v60 }
 0x355   :  { %2215 = vmatpush1.bf16.msra.mxu0 %v2754_v47  ;;  %2247 = vmatpush1.bf16.msra.mxu1 %v2777_v7 }
 0x356   :  { %2217 = vmatprep.subr.bf16.mxu0 %v2759_v52  ;;  %2249 = vmatprep.subr.bf16.mxu1 %v2783_v10 }
 0x359   :  { %2219 = vmatpush1.bf16.msra.mxu0 %v2769_v59  ;;  %2251 = vmatpush1.bf16.msra.mxu1 %v2789_v23 }
 0x35a   :  { %2221 = vmatprep.subr.bf16.mxu0 %v2774_v0  ;;  %2253 = vmatprep.subr.bf16.mxu1 %v2795_v27 }
 0x35d   :  { %2223 = vmatpush1.bf16.msra.mxu0 %v2781_v9  ;;  %2255 = vmatpush1.bf16.msra.mxu1 %v2801_v38 }
 0x35e   :  { %2225 = vmatprep.subr.bf16.mxu0 %v2786_v15  ;;  %2257 = vmatprep.subr.bf16.mxu1 %v2807_v41 }
 0x361   :  { %2227 = vmatpush1.bf16.msra.mxu0 %v2793_v26  ;;  %2259 = vmatpush1.bf16.msra.mxu1 %v2811_v49 }
 0x362   :  { %2229 = vmatprep.subr.bf16.mxu0 %v2798_v31  ;;  %2261 = vmatprep.subr.bf16.mxu1 %v2815_v50 }
 0x365   :  { %2231 = vmatpush1.bf16.msra.mxu0 %v2805_v39  ;;  %2263 = vmatpush1.bf16.msra.mxu1 %v2820_v54 }
 0x366   :  { %2265 = vmatprep.subr.bf16.mxu0 %v2705_v8  ;;  %2297 = vmatprep.subr.bf16.mxu1 %v2729_v24 }
 0x41b   :  { %v904_v61 = vpop.f32.mrb[6].mxu0  ;;  %v975_v21 = vpop.f32.mrb[14].mxu1 }
 0x41c   :  { %v984_v43 = vrot.slane %v904_v61, 2  ;;  %v906_v44 = vpop.f32.mrb[7].mxu0  ;;  %v977_v45 = vpop.f32.mrb[15].mxu1  ;;  %v986_v4 = vrot.slane %v975_v21, 2 }
 0x41d   :  { %v985_v53 = vrot.slane %v906_v44, 2  ;;  %v987_v2 = vrot.slane %v977_v45, 2 }
 0x41e   :  { %v992_v56 = vadd.f32 %v984_v43, %v2871_v34  ;;  %v994_v11 = vadd.f32 %v986_v4, %v2880_v62 }
 0x41f   :  { %v993_v57 = vadd.f32 %v985_v53, %v2873_v37  ;;  %v995_v3 = vadd.f32 %v987_v2, %v2877_v55 }
 0x420   :  { %v1876_v51 = vmul.f32 -1.442695, %v992_v56 }
 0x421   :  { %v1877_v63 = vmul.f32 -1.442695, %v993_v57  ;;  %v1878_v17 = vmul.f32 -1.442695, %v995_v3 }
 0x422   :  { %2534 = vpow2.f32 %v1876_v51 }
 0x423   :  { %2536 = vpow2.f32 %v1877_v63 }
 0x424   :  { %2538 = vpow2.f32 %v1878_v17 }
 0x425   :  { %2540 = vtanh.f32 %v994_v11 }
 0x42c   :  { %v2535_v14 = vpop.eup %2534 }
 0x42d   :  { %v2537_v18 = vpop.eup %2536  ;;  %v999_v5 = vadd.f32 1.0, %v2535_v14 }
 0x42e   :  { %v1005_v22 = vadd.f32 1.0, %v2537_v18  ;;  %v2539_v34 = vpop.eup %2538 }
 0x42f   :  { %2542 = vrcp.f32 %v999_v5  ;;  %v2541_v37 = vpop.eup %2540  ;;  %v1012_v55 = vadd.f32 1.0, %v2539_v34 }
 0x430   :  { %2544 = vrcp.f32 %v1005_v22 }
 0x431   :  { %2546 = vrcp.f32 %v1012_v55 }
 0x439   :  { %v2543_v28 = vpop.eup %2542 }
 0x43a   :  { %v2545_v42 = vpop.eup %2544  ;;  %v1019_v61 = vmul.f32 %v2543_v28, %v2541_v37 }
 0x43b   :  { %v1018_v21 = vmul.f32 %v2545_v42, %v1016_v30  ;;  %v2547_v62 = vpop.eup %2546 }
 0x43d   :  { %v3009_v43 = vadd.f32 %v1019_v61, %v1018_v21 }
 0x43f   :  { %2548 = vtanh.f32 %v3009_v43  ;;  %v1192_v42 = vrot.slane %v3009_v43, 6 }
 0x449   :  { %v2549_v44 = vpop.eup %2548 }
 0x44a   :  { %v1022_v45 = vmul.f32 %v2549_v44, %v2547_v62 }
 0x44c   :  { %v1024_v53 = vrot.slane %v1022_v45, 6 }
 0x44e   :  { %1091 = vmatmul.mubr.f32.vlgmr.msra.gmra.mrb[8].mxu0 %v1024_v53  ;;  %1162 = vmatmul.mubr.f32.vlgmr.msra.gmra.mrb[16].mxu1 %v1024_v53 }
 0x44f   :  { %2267 = vmatpush1.bf16.msra.mxu0 %v2713_v12  ;;  %2299 = vmatpush1.bf16.msra.mxu1 %v2737_v32 }
 0x450   :  { %2269 = vmatprep.subr.bf16.mxu0 %v2720_v16  ;;  %2301 = vmatprep.subr.bf16.mxu1 %v2742_v36 }
 0x451   :  { %1263 = vmatprep.mubr.f32.mxu0 %v2641_v1  ;;  %1334 = vmatprep.mubr.f32.mxu1 %v2641_v1 }
 0x453   :  { %2271 = vmatpush1.bf16.msra.mxu0 %v2726_v20  ;;  %2303 = vmatpush1.bf16.msra.mxu1 %v2749_v46 }
 0x454   :  { %2273 = vmatprep.subr.bf16.mxu0 %v2731_v25  ;;  %2305 = vmatprep.subr.bf16.mxu1 %v2756_v48 }
 0x457   :  { %2275 = vmatpush1.bf16.msra.mxu0 %v2740_v35  ;;  %2307 = vmatpush1.bf16.msra.mxu1 %v2764_v58 }
 0x458   :  { %2277 = vmatprep.subr.bf16.mxu0 %v2745_v40  ;;  %2309 = vmatprep.subr.bf16.mxu1 %v2771_v60 }
 0x45b   :  { %2279 = vmatpush1.bf16.msra.mxu0 %v2754_v47  ;;  %2311 = vmatpush1.bf16.msra.mxu1 %v2777_v7 }
 0x45c   :  { %2281 = vmatprep.subr.bf16.mxu0 %v2759_v52  ;;  %2313 = vmatprep.subr.bf16.mxu1 %v2783_v10 }
 0x45f   :  { %2283 = vmatpush1.bf16.msra.mxu0 %v2769_v59  ;;  %2315 = vmatpush1.bf16.msra.mxu1 %v2789_v23 }
 0x460   :  { %2285 = vmatprep.subr.bf16.mxu0 %v2774_v0  ;;  %2317 = vmatprep.subr.bf16.mxu1 %v2795_v27 }
 0x463   :  { %2287 = vmatpush1.bf16.msra.mxu0 %v2781_v9  ;;  %2319 = vmatpush1.bf16.msra.mxu1 %v2801_v38 }
 0x464   :  { %2289 = vmatprep.subr.bf16.mxu0 %v2786_v15  ;;  %2321 = vmatprep.subr.bf16.mxu1 %v2807_v41 }
 0x467   :  { %2291 = vmatpush1.bf16.msra.mxu0 %v2793_v26  ;;  %2323 = vmatpush1.bf16.msra.mxu1 %v2811_v49 }
 0x468   :  { %2293 = vmatprep.subr.bf16.mxu0 %v2798_v31  ;;  %2325 = vmatprep.subr.bf16.mxu1 %v2815_v50 }
 0x46b   :  { %2295 = vmatpush1.bf16.msra.mxu0 %v2805_v39  ;;  %2327 = vmatpush1.bf16.msra.mxu1 %v2820_v54 }
 0x46c   :  { %2329 = vmatprep.subr.bf16.mxu0 %v2705_v8  ;;  %2361 = vmatprep.subr.bf16.mxu1 %v2729_v24 }
 0x521   :  { %v1092_v19 = vpop.f32.mrb[8].mxu0  ;;  %v1163_v56 = vpop.f32.mrb[16].mxu1 }
 0x522   :  { %v1168_v57 = vadd.f32 %v1092_v19, %v2863_v6  ;;  %v1094_v51 = vpop.f32.mrb[9].mxu0  ;;  %v1165_v63 = vpop.f32.mrb[17].mxu1  ;;  %v1170_v14 = vadd.f32 %v1163_v56, %v2867_v29 }
 0x523   :  { %v1169_v2 = vadd.f32 %v1094_v51, %v2865_v13  ;;  %v1171_v17 = vadd.f32 %v1165_v63, %v2869_v33 }
 0x524   :  { %v1879_v3 = vmul.f32 -1.442695, %v1168_v57 }
 0x525   :  { %v1880_v4 = vmul.f32 -1.442695, %v1169_v2  ;;  %v1881_v11 = vmul.f32 -1.442695, %v1171_v17 }
 0x526   :  { %2550 = vpow2.f32 %v1879_v3 }
 0x527   :  { %2552 = vpow2.f32 %v1880_v4 }
 0x528   :  { %2554 = vpow2.f32 %v1881_v11 }
 0x529   :  { %2556 = vtanh.f32 %v1170_v14 }
 0x530   :  { %v2551_v18 = vpop.eup %2550 }
 0x531   :  { %v2553_v5 = vpop.eup %2552  ;;  %v1175_v22 = vadd.f32 1.0, %v2551_v18 }
 0x532   :  { %v1181_v34 = vadd.f32 1.0, %v2553_v5  ;;  %v2555_v37 = vpop.eup %2554 }
 0x533   :  { %2558 = vrcp.f32 %v1175_v22  ;;  %v2557_v28 = vpop.eup %2556  ;;  %v1188_v21 = vadd.f32 1.0, %v2555_v37 }
 0x534   :  { %2560 = vrcp.f32 %v1181_v34 }
 0x535   :  { %2562 = vrcp.f32 %v1188_v21 }
 0x53d   :  { %v2559_v30 = vpop.eup %2558 }
 0x53e   :  { %v2561_v61 = vpop.eup %2560  ;;  %v1195_v55 = vmul.f32 %v2559_v30, %v2557_v28 }
 0x53f   :  { %v1194_v62 = vmul.f32 %v2561_v61, %v1192_v42  ;;  %v2563_v45 = vpop.eup %2562 }
 0x541   :  { %v3051_v44 = vadd.f32 %v1195_v55, %v1194_v62 }
 0x543   :  { %2564 = vtanh.f32 %v3051_v44  ;;  %v1377_v55 = vrot.slane %v3051_v44, 6 }
 0x54d   :  { %v2565_v53 = vpop.eup %2564 }
 0x54e   :  { %v1198_v19 = vmul.f32 %v2565_v53, %v2563_v45 }
 0x550   :  { %1264 = vmatmul.mubr.f32.vlgmr.msra.gmra.mrb[10].mxu0 %v1198_v19  ;;  %1335 = vmatmul.mubr.f32.vlgmr.msra.gmra.mrb[18].mxu1 %v1198_v19 }
 0x551   :  { %2331 = vmatpush1.bf16.msra.mxu0 %v2713_v12  ;;  %2363 = vmatpush1.bf16.msra.mxu1 %v2737_v32 }
 0x552   :  { %2333 = vmatprep.subr.bf16.mxu0 %v2720_v16  ;;  %2365 = vmatprep.subr.bf16.mxu1 %v2742_v36 }
 0x553   :  { %1451 = vmatprep.mubr.f32.mxu0 %v2641_v1  ;;  %1522 = vmatprep.mubr.f32.mxu1 %v2641_v1 }
 0x555   :  { %2335 = vmatpush1.bf16.msra.mxu0 %v2726_v20  ;;  %2367 = vmatpush1.bf16.msra.mxu1 %v2749_v46 }
 0x556   :  { %2337 = vmatprep.subr.bf16.mxu0 %v2731_v25  ;;  %2369 = vmatprep.subr.bf16.mxu1 %v2756_v48 }
 0x559   :  { %2339 = vmatpush1.bf16.msra.mxu0 %v2740_v35  ;;  %2371 = vmatpush1.bf16.msra.mxu1 %v2764_v58 }
 0x55a   :  { %2341 = vmatprep.subr.bf16.mxu0 %v2745_v40  ;;  %2373 = vmatprep.subr.bf16.mxu1 %v2771_v60 }
 0x55d   :  { %2343 = vmatpush1.bf16.msra.mxu0 %v2754_v47  ;;  %2375 = vmatpush1.bf16.msra.mxu1 %v2777_v7 }
 0x55e   :  { %2345 = vmatprep.subr.bf16.mxu0 %v2759_v52  ;;  %2377 = vmatprep.subr.bf16.mxu1 %v2783_v10 }
 0x561   :  { %2347 = vmatpush1.bf16.msra.mxu0 %v2769_v59  ;;  %2379 = vmatpush1.bf16.msra.mxu1 %v2789_v23 }
 0x562   :  { %2349 = vmatprep.subr.bf16.mxu0 %v2774_v0  ;;  %2381 = vmatprep.subr.bf16.mxu1 %v2795_v27 }
 0x565   :  { %2351 = vmatpush1.bf16.msra.mxu0 %v2781_v9  ;;  %2383 = vmatpush1.bf16.msra.mxu1 %v2801_v38 }
 0x566   :  { %2353 = vmatprep.subr.bf16.mxu0 %v2786_v15  ;;  %2385 = vmatprep.subr.bf16.mxu1 %v2807_v41 }
 0x569   :  { %2355 = vmatpush1.bf16.msra.mxu0 %v2793_v26  ;;  %2387 = vmatpush1.bf16.msra.mxu1 %v2811_v49 }
 0x56a   :  { %2357 = vmatprep.subr.bf16.mxu0 %v2798_v31  ;;  %2389 = vmatprep.subr.bf16.mxu1 %v2815_v50 }
 0x56d   :  { %2359 = vmatpush1.bf16.msra.mxu0 %v2805_v39  ;;  %2391 = vmatpush1.bf16.msra.mxu1 %v2820_v54 }
 0x56e   :  { %2393 = vmatprep.subr.bf16.mxu0 %v2705_v8  ;;  %2425 = vmatprep.subr.bf16.mxu1 %v2729_v24 }
 0x623   :  { %v1265_v43 = vpop.f32.mrb[10].mxu0  ;;  %v1336_v56 = vpop.f32.mrb[18].mxu1 }
 0x624   :  { %v1345_v57 = vrot.slane %v1265_v43, 6  ;;  %v1267_v51 = vpop.f32.mrb[11].mxu0  ;;  %v1338_v63 = vpop.f32.mrb[19].mxu1  ;;  %v1347_v8 = vrot.slane %v1336_v56, 6 }
 0x625   :  { %v1346_v2 = vrot.slane %v1267_v51, 6  ;;  %v1348_v14 = vrot.slane %v1338_v63, 6 }
 0x626   :  { %v1353_v3 = vadd.f32 %v1345_v57, %v2863_v6  ;;  %v1355_v24 = vadd.f32 %v1347_v8, %v2867_v29  ;;  %v1764_v8 = vld [vmem:[%s3197_s4 + $0x20] sm:$0xff] }
 0x627   :  { %v1354_v4 = vadd.f32 %v1346_v2, %v2865_v13  ;;  %v1356_v18 = vadd.f32 %v1348_v14, %v2869_v33  ;;  %v1760_v2 = vld [vmem:[%s3197_s4] sm:$0xff]  ;;  %v1763_v14 = vld [vmem:[%s3197_s4 + $0x18] sm:$0xff] }
 0x628   :  { %v1882_v17 = vmul.f32 -1.442695, %v1353_v3  ;;  %v1761_v3 = vld [vmem:[%s3197_s4 + $0x8] sm:$0xff] }
 0x629   :  { %v1883_v11 = vmul.f32 -1.442695, %v1354_v4  ;;  %v1884_v5 = vmul.f32 -1.442695, %v1356_v18  ;;  %v2457_v4 = vpack.c.bf16 %v1761_v3, %v1760_v2 }
 0x62a   :  { %2566 = vpow2.f32 %v1882_v17  ;;  %v2642_v17 = vmov 0.0|0.0  }
 0x62b   :  { %2568 = vpow2.f32 %v1883_v11  ;;  %v1762_v11 = vld [vmem:[%s3197_s4 + $0x10] sm:$0xff] }
 0x62c   :  { %2570 = vpow2.f32 %v1884_v5  ;;  %v2460_v18 = vpack.c.bf16 %v1763_v14, %v1762_v11  ;;  %v1765_v5 = vld [vmem:[%s3197_s4 + $0x28] sm:$0xff] }
 0x62d   :  { %2572 = vtanh.f32 %v1355_v24  ;;  %v2463_v24 = vpack.c.bf16 %v1765_v5, %v1764_v8 }
 0x634   :  { %v2567_v22 = vpop.eup %2566 }
 0x635   :  { %v2569_v34 = vpop.eup %2568  ;;  %v1360_v37 = vadd.f32 1.0, %v2567_v22  ;;  %v1766_v22 = vld [vmem:[%s3197_s4 + $0x30] sm:$0xff] }
 0x636   :  { %v1366_v28 = vadd.f32 1.0, %v2569_v34  ;;  %v2571_v30 = vpop.eup %2570  ;;  %v1767_v34 = vld [vmem:[%s3197_s4 + $0x38] sm:$0xff] }
 0x637   :  { %2574 = vrcp.f32 %v1360_v37  ;;  %v2573_v42 = vpop.eup %2572  ;;  %v1373_v45 = vadd.f32 1.0, %v2571_v30  ;;  %v2466_v37 = vpack.c.bf16 %v1767_v34, %v1766_v22  ;;  %v1769_v30 = vld [vmem:[%s3197_s4 + $0x48] sm:$0xff] }
 0x638   :  { %2576 = vrcp.f32 %v1366_v28  ;;  %v1768_v28 = vld [vmem:[%s3197_s4 + $0x40] sm:$0xff] }
 0x639   :  { %2578 = vrcp.f32 %v1373_v45 }
 0x641   :  { %v2575_v61 = vpop.eup %2574 }
 0x642   :  { %v2577_v21 = vpop.eup %2576  ;;  %v1380_v62 = vmul.f32 %v2575_v61, %v2573_v42  ;;  %v2469_v42 = vpack.c.bf16 %v1769_v30, %v1768_v28  ;;  %v1770_v61 = vld [vmem:[%s3197_s4 + $0x50] sm:$0xff] }
 0x643   :  { %v1379_v53 = vmul.f32 %v2577_v21, %v1377_v55  ;;  %v2579_v43 = vpop.eup %2578  ;;  %v1771_v55 = vld [vmem:[%s3197_s4 + $0x58] sm:$0xff] }
 0x644   :  { %v2472_v21 = vpack.c.bf16 %v1771_v55, %v1770_v61 }
 0x645   :  { %v3093_v19 = vadd.f32 %v1380_v62, %v1379_v53  ;;  %v1772_v62 = vld [vmem:[%s3197_s4 + $0x60] sm:$0xff]  ;;  %v1774_v53 = vld [vmem:[%s3197_s4 + $0x70] sm:$0xff] }
 0x647   :  { %2580 = vtanh.f32 %v3093_v19 }
 0x651   :  { %v2581_v56 = vpop.eup %2580 }
 0x652   :  { %v1383_v57 = vmul.f32 %v2581_v56, %v2579_v43 }
 0x654   :  { %v1385_v51 = vrot.slane %v1383_v57, 2 }
 0x656   :  { %1452 = vmatmul.mubr.f32.vlgmr.msra.gmra.mrb[12].mxu0 %v1385_v51  ;;  %1523 = vmatmul.mubr.f32.vlgmr.msra.gmra.mrb[20].mxu1 %v1385_v51 }
 0x657   :  { %2395 = vmatpush1.bf16.msra.mxu0 %v2713_v12  ;;  %2427 = vmatpush1.bf16.msra.mxu1 %v2737_v32 }
 0x658   :  { %2397 = vmatprep.subr.bf16.mxu0 %v2720_v16  ;;  %2429 = vmatprep.subr.bf16.mxu1 %v2742_v36 }
 0x659   :  { %1639 = vmatprep.mubr.f32.mxu0 %v2641_v1  ;;  %1710 = vmatprep.mubr.f32.mxu1 %v2641_v1 }
 0x65b   :  { %2399 = vmatpush1.bf16.msra.mxu0 %v2726_v20  ;;  %2431 = vmatpush1.bf16.msra.mxu1 %v2749_v46 }
 0x65c   :  { %2401 = vmatprep.subr.bf16.mxu0 %v2731_v25  ;;  %2433 = vmatprep.subr.bf16.mxu1 %v2756_v48 }
 0x65f   :  { %2403 = vmatpush1.bf16.msra.mxu0 %v2740_v35  ;;  %2435 = vmatpush1.bf16.msra.mxu1 %v2764_v58 }
 0x660   :  { %2405 = vmatprep.subr.bf16.mxu0 %v2745_v40  ;;  %2437 = vmatprep.subr.bf16.mxu1 %v2771_v60 }
 0x663   :  { %2407 = vmatpush1.bf16.msra.mxu0 %v2754_v47  ;;  %2439 = vmatpush1.bf16.msra.mxu1 %v2777_v7 }
 0x664   :  { %2409 = vmatprep.subr.bf16.mxu0 %v2759_v52  ;;  %2441 = vmatprep.subr.bf16.mxu1 %v2783_v10 }
 0x667   :  { %2411 = vmatpush1.bf16.msra.mxu0 %v2769_v59  ;;  %2443 = vmatpush1.bf16.msra.mxu1 %v2789_v23 }
 0x668   :  { %2413 = vmatprep.subr.bf16.mxu0 %v2774_v0  ;;  %2445 = vmatprep.subr.bf16.mxu1 %v2795_v27  ;;  %v1565_v27 = vrot.slane %v3093_v19, 6  ;;  %v1775_v19 = vld [vmem:[%s3197_s4 + $0x78] sm:$0xff] }
 0x669   :  { %v2478_v43 = vpack.c.bf16 %v1775_v19, %v1774_v53 }
 0x66b   :  { %2415 = vmatpush1.bf16.msra.mxu0 %v2781_v9  ;;  %2447 = vmatpush1.bf16.msra.mxu1 %v2801_v38 }
 0x66c   :  { %2417 = vmatprep.subr.bf16.mxu0 %v2786_v15  ;;  %2449 = vmatprep.subr.bf16.mxu1 %v2807_v41 }
 0x66f   :  { %2419 = vmatpush1.bf16.msra.mxu0 %v2793_v26  ;;  %2451 = vmatpush1.bf16.msra.mxu1 %v2811_v49 }
 0x670   :  { %2421 = vmatprep.subr.bf16.mxu0 %v2798_v31  ;;  %2453 = vmatprep.subr.bf16.mxu1 %v2815_v50 }
 0x673   :  { %2423 = vmatpush1.bf16.msra.mxu0 %v2805_v39  ;;  %2455 = vmatpush1.bf16.msra.mxu1 %v2820_v54 }
 0x674   :  { %2456 = vmatprep.subr.bf16.mxu0 %v2642_v17 }
 0x729   :  { %v1453_v12 = vpop.f32.mrb[12].mxu0  ;;  %v1524_v16 = vpop.f32.mrb[20].mxu1 }
 0x72a   :  { %v1533_v20 = vrot.slane %v1453_v12, 4  ;;  %v1455_v25 = vpop.f32.mrb[13].mxu0  ;;  %v1526_v32 = vpop.f32.mrb[21].mxu1  ;;  %v1535_v58 = vrot.slane %v1524_v16, 4 }
 0x72b   :  { %v1534_v35 = vrot.slane %v1455_v25, 4  ;;  %v1536_v48 = vrot.slane %v1526_v32, 4 }
 0x72c   :  { %v1541_v36 = vadd.f32 %v1533_v20, %v2863_v6  ;;  %v1543_v60 = vadd.f32 %v1535_v58, %v2867_v29 }
 0x72d   :  { %v1542_v40 = vadd.f32 %v1534_v35, %v2865_v13  ;;  %v1544_v52 = vadd.f32 %v1536_v48, %v2869_v33 }
 0x72e   :  { %v1885_v46 = vmul.f32 -1.442695, %v1541_v36 }
 0x72f   :  { %v1886_v47 = vmul.f32 -1.442695, %v1542_v40  ;;  %v1887_v59 = vmul.f32 -1.442695, %v1544_v52 }
 0x730   :  { %2582 = vpow2.f32 %v1885_v46 }
 0x731   :  { %2584 = vpow2.f32 %v1886_v47 }
 0x732   :  { %2586 = vpow2.f32 %v1887_v59 }
 0x733   :  { %2588 = vtanh.f32 %v1543_v60 }
 0x73a   :  { %v2583_v0 = vpop.eup %2582 }
 0x73b   :  { %v2585_v7 = vpop.eup %2584  ;;  %v1548_v9 = vadd.f32 1.0, %v2583_v0 }
 0x73c   :  { %v1554_v10 = vadd.f32 1.0, %v2585_v7  ;;  %v2587_v15 = vpop.eup %2586 }
 0x73d   :  { %2590 = vrcp.f32 %v1548_v9  ;;  %v2589_v23 = vpop.eup %2588  ;;  %v1561_v39 = vadd.f32 1.0, %v2587_v15 }
 0x73e   :  { %2592 = vrcp.f32 %v1554_v10 }
 0x73f   :  { %2594 = vrcp.f32 %v1561_v39  ;;  %v1891_v39 = vld [vmem:[#allocation2] ss:$0 sm:$0xff] }
 0x747   :  { %v2591_v26 = vpop.eup %2590 }
 0x748   :  { %v2593_v31 = vpop.eup %2592  ;;  %v1568_v38 = vmul.f32 %v2591_v26, %v2589_v23 }
 0x749   :  { %v1567_v41 = vmul.f32 %v2593_v31, %v1565_v27  ;;  %v2595_v50 = vpop.eup %2594 }
 0x74b   :  { %v3133_v49 = vadd.f32 %v1568_v38, %v1567_v41 }
 0x74d   :  { %2596 = vtanh.f32 %v3133_v49  ;;  %v1753_v9 = vrot.slane %v3133_v49, 6 }
 0x757   :  { %v2597_v54 = vpop.eup %2596 }
 0x758   :  { %v1571_v44 = vmul.f32 %v2597_v54, %v2595_v50 }
 0x75a   :  { %v1573_v63 = vrot.slane %v1571_v44, 4 }
 0x75c   :  { %1640 = vmatmul.mubr.f32.vlgmr.msra.gmra.mrb[14].mxu0 %v1573_v63  ;;  %1711 = vmatmul.mubr.f32.vlgmr.msra.gmra.mrb[22].mxu1 %v1573_v63 }
 0x75d   :  { %2458 = vmatpush3.bf16.msra.mxu0 %v2457_v4  ;;  %1941 = vmatprep.mubr.msk.f32.mxu0 %vm2643_vm1, %v2641_v1  ;;  %v1773_v1 = vld [vmem:[%s3197_s4 + $0x68] sm:$0xff] }
 0x75e   :  { %2459 = vmatprep.subr.bf16.mxu0 %v2642_v17  ;;  %v2475_v45 = vpack.c.bf16 %v1773_v1, %v1772_v62 }
 0x761   :  { %2461 = vmatpush3.bf16.msra.mxu0 %v2460_v18 }
 0x762   :  { %2462 = vmatprep.subr.bf16.mxu0 %v2642_v17 }
 0x765   :  { %2464 = vmatpush3.bf16.msra.mxu0 %v2463_v24 }
 0x766   :  { %2465 = vmatprep.subr.bf16.mxu0 %v2642_v17 }
 0x769   :  { %2467 = vmatpush3.bf16.msra.mxu0 %v2466_v37 }
 0x76a   :  { %2468 = vmatprep.subr.bf16.mxu0 %v2642_v17 }
 0x76d   :  { %2470 = vmatpush3.bf16.msra.mxu0 %v2469_v42 }
 0x76e   :  { %2471 = vmatprep.subr.bf16.mxu0 %v2642_v17 }
 0x771   :  { %2473 = vmatpush3.bf16.msra.mxu0 %v2472_v21 }
 0x772   :  { %2474 = vmatprep.subr.bf16.mxu0 %v2642_v17 }
 0x775   :  { %2476 = vmatpush3.bf16.msra.mxu0 %v2475_v45 }
 0x776   :  { %2477 = vmatprep.subr.bf16.mxu0 %v2642_v17 }
 0x779   :  { %2479 = vmatpush3.bf16.msra.mxu0 %v2478_v43 }
 0x82f   :  { %v1641_v56 = vpop.f32.mrb[14].mxu0  ;;  %v1712_v57 = vpop.f32.mrb[22].mxu1 }
 0x830   :  { %v1721_v51 = vrot.slane %v1641_v56, 2  ;;  %v1643_v12 = vpop.f32.mrb[15].mxu0  ;;  %v1714_v16 = vpop.f32.mrb[23].mxu1  ;;  %v1723_v47 = vrot.slane %v1712_v57, 2 }
 0x831   :  { %v1722_v20 = vrot.slane %v1643_v12, 2  ;;  %v1724_v40 = vrot.slane %v1714_v16, 2 }
 0x832   :  { %v1729_v25 = vadd.f32 %v1721_v51, %v2863_v6  ;;  %v1731_v52 = vadd.f32 %v1723_v47, %v2867_v29 }
 0x833   :  { %v1730_v32 = vadd.f32 %v1722_v20, %v2865_v13  ;;  %v1732_v46 = vadd.f32 %v1724_v40, %v2869_v33 }
 0x834   :  { %v1888_v35 = vmul.f32 -1.442695, %v1729_v25 }
 0x835   :  { %v1889_v36 = vmul.f32 -1.442695, %v1730_v32  ;;  %v1890_v48 = vmul.f32 -1.442695, %v1732_v46 }
 0x836   :  { %2598 = vpow2.f32 %v1888_v35 }
 0x837   :  { %2600 = vpow2.f32 %v1889_v36 }
 0x838   :  { %2602 = vpow2.f32 %v1890_v48 }
 0x839   :  { %2604 = vtanh.f32 %v1731_v52 }
 0x840   :  { %v2599_v58 = vpop.eup %2598 }
 0x841   :  { %v2601_v59 = vpop.eup %2600  ;;  %v1736_v60 = vadd.f32 1.0, %v2599_v58 }
 0x842   :  { %v1742_v0 = vadd.f32 1.0, %v2601_v59  ;;  %v2603_v6 = vpop.eup %2602 }
 0x843   :  { %2606 = vrcp.f32 %v1736_v60  ;;  %v2605_v13 = vpop.eup %2604  ;;  %v1749_v33 = vadd.f32 1.0, %v2603_v6 }
 0x844   :  { %2608 = vrcp.f32 %v1742_v0 }
 0x845   :  { %2610 = vrcp.f32 %v1749_v33 }
 0x84d   :  { %v2607_v7 = vpop.eup %2606 }
 0x84e   :  { %v2609_v10 = vpop.eup %2608  ;;  %v1756_v15 = vmul.f32 %v2607_v7, %v2605_v13 }
 0x84f   :  { %v1755_v23 = vmul.f32 %v2609_v10, %v1753_v9  ;;  %v2611_v29 = vpop.eup %2610 }
 0x851   :  { %v1757_v26 = vadd.f32 %v1756_v15, %v1755_v23 }
 0x853   :  { %2612 = vtanh.f32 %v1757_v26 }
 0x85d   :  { %v2613_v27 = vpop.eup %2612 }
 0x85e   :  { %v1759_v31 = vmul.f32 %v2613_v27, %v2611_v29 }
 0x860   :  { %v1784_v38 = vrot.slane %v1759_v31, 6 }
 0x862   :  { %1942 = vmatmul.mubr.f32.vlgmr.msra.gmra.mrb[16].mxu0 %v1784_v38 }
 0x935   :  { %v1852_v41 = vpop.f32.mrb[16].mxu0 }
 0x936   :  { %v1853_v50 = vadd.f32 %v1891_v39, %v1852_v41  ;;  %v1943_v54 = vpop.f32.mrb[17].mxu0 }
 0x938   :  { %1857 = vst.msk [vmem:[%s3199_s6] sm:$0x3] %vm1856_vm2, %v1853_v50 }
 0x939   :  { %1862 = vsyncpa [#allocation4], 1 }

</bundles_post_ra>
